<compile_context>
chip_gen: v7x
topology: tpu7x:2x2x1
jax: 0.10.0
libtpu: 0.0.40
codegen_flags: <defaults>
</compile_context>

<pallas_src>
import jax
import jax.numpy as jnp
from jax import lax
from jax.experimental import pallas as pl
from jax.experimental.pallas import tpu as pltpu


# ----------------------------------------------------------------------------
# Fused multi-layer LSTM kernel: whole stack, full sequence, recurrence loops
# inside the kernel.  Everything (inputs, weights, states, intermediate
# activations) lives in VMEM.
# ----------------------------------------------------------------------------
def make_lstm_stack_kernel(num_layers, seq_len, batch, hidden):
    T, B, H = seq_len, batch, hidden

    def kernel(*refs):
        # inputs: x_flat, (wih, whh, bias) * L, h0, c0
        x_ref = refs[0]
        w_refs = refs[1:1 + 3 * num_layers]
        h0_ref = refs[1 + 3 * num_layers]
        c0_ref = refs[2 + 3 * num_layers]
        # outputs
        out_ref, hn_ref, cn_ref = refs[3 + 3 * num_layers:6 + 3 * num_layers]
        # scratch
        (gx_sc,) = refs[6 + 3 * num_layers:]

        # Gate-column mask, hoisted (JAX does not CSE broadcast_in_dim).
        # Columns [3H:4H] hold the cell gate "g" in the wrapper's packed
        # [i, f, o, g] layout (g's weights/bias pre-scaled by 2).
        g_mask = lax.broadcasted_iota(jnp.int32, (B, 4 * H), 1) >= 3 * H

        for layer in range(num_layers):
            wih = w_refs[3 * layer][...]      # (in_dim, 4H)
            whh = w_refs[3 * layer + 1][...]  # (H, 4H)
            b = w_refs[3 * layer + 2][...]    # (1, 4H)

            # ---- hoisted input projection + bias: one MXU call over T*B rows.
            # Layer l+1 reads layer l's activations straight out of out_ref
            # (valid only while out_ref is whole-array VMEM-resident).
            x_in = x_ref[...] if layer == 0 else out_ref[...]
            gx_sc[...] = jnp.dot(x_in, wih,
                                 preferred_element_type=jnp.float32) + b

            # h/c live in vregs across the recurrence (no VMEM round trips).
            h = h0_ref[layer]
            c = c0_ref[layer]

            # Static Python loop: compile-time slab addresses, full
            # cross-step visibility for the scheduler.
            for t in range(T):
                # Only the recurrent matmul remains on the per-step path.
                gates = gx_sc[pl.ds(t * B, B), :] + jnp.dot(
                    h, whh, preferred_element_type=jnp.float32)
                # One full-(B,4H) sigmoid on the EUP; tanh(g) recovered as
                # 2*sigmoid(2g) - 1 on the g lanes (one fma + one select).
                sig = jax.nn.sigmoid(gates)
                act = jnp.where(g_mask, 2.0 * sig - 1.0, sig)
                i_g = act[:, 0 * H:1 * H]
                f_g = act[:, 1 * H:2 * H]
                o_g = act[:, 2 * H:3 * H]
                g_g = act[:, 3 * H:4 * H]
                c = f_g * c + i_g * g_g
                h = o_g * jnp.tanh(c)
                out_ref[pl.ds(t * B, B), :] = h.astype(out_ref.dtype)

            hn_ref[layer] = h
            cn_ref[layer] = c

    return kernel


# ----------------------------------------------------------------------------
# Weight packing: PyTorch [i, f, g, o] row-blocks -> [i, f, o, 2*g], transposed
# so the kernel does x @ W with the 4H axis on lanes.
# ----------------------------------------------------------------------------
def _pack_gates(w_ih, w_hh, b_ih, b_hh, hidden):
    H = hidden

    def reorder(m):
        i_, f_, g_, o_ = m[0:H], m[H:2 * H], m[2 * H:3 * H], m[3 * H:4 * H]
        return jnp.concatenate([i_, f_, o_, 2.0 * g_], axis=0)

    wih = jnp.transpose(reorder(w_ih))                    # (in_dim, 4H)
    whh = jnp.transpose(reorder(w_hh))                    # (H, 4H)
    bias = reorder(b_ih + b_hh).reshape(1, 4 * H)         # (1, 4H)
    return wih, whh, bias


# ----------------------------------------------------------------------------
# LSTMActor forward: one fused pallas_call for the whole layer stack
# (batch_first semantics at the boundary).
# ----------------------------------------------------------------------------
def lstm_actor_forward(inputs, h0, c0, params):
    """
    inputs: (B, T, input_size)      -- batch_first, like PyTorch
    h0, c0: (num_layers, B, H)
    params: list of dicts with 'w_ih' (4H, in), 'w_hh' (4H, H), 'b_ih', 'b_hh' (4H,)
    returns: output (B, T, H), (h_n, c_n) each (num_layers, B, H)
    """
    B, T, _ = inputs.shape
    L, _, H = h0.shape

    # time-major, row-dense (T*B, I) slab; layout plumbing stays in XLA
    x_flat = jnp.transpose(inputs, (1, 0, 2)).reshape(T * B, -1)

    args = [x_flat]
    for p in params:
        wih, whh, bias = _pack_gates(p["w_ih"], p["w_hh"], p["b_ih"], p["b_hh"], H)
        args += [wih, whh, bias]
    args += [h0, c0]

    vmem = pl.BlockSpec(memory_space=pltpu.MemorySpace.VMEM)
    out_shapes = (
        jax.ShapeDtypeStruct((T * B, H), jnp.float32),   # per-step hidden (last layer)
        jax.ShapeDtypeStruct((L, B, H), jnp.float32),    # h_n
        jax.ShapeDtypeStruct((L, B, H), jnp.float32),    # c_n
    )

    out_flat, h_n, c_n = pl.pallas_call(
        make_lstm_stack_kernel(L, T, B, H),
        out_shape=out_shapes,
        in_specs=[vmem] * len(args),
        out_specs=(vmem, vmem, vmem),
        scratch_shapes=[
            pltpu.VMEM((T * B, 4 * H), jnp.float32),     # hoisted input-projection gates
        ],
    )(*args)

    output = jnp.transpose(out_flat.reshape(T, B, H), (1, 0, 2))   # back to (B, T, H)
    return output, (h_n, c_n)


# ----------------------------------------------------------------------------
# Pure-JAX reference (standard LSTM math, PyTorch gate order) for verification.
# ----------------------------------------------------------------------------
def lstm_actor_reference(inputs, h0, c0, params):
    H = h0.shape[-1]
    x = inputs
    hns, cns = [], []
    for l, p in enumerate(params):
        wih_t = p["w_ih"].T
        whh_t = p["w_hh"].T
        bias = p["b_ih"] + p["b_hh"]

        def step(carry, x_t):
            h, c = carry
            gates = x_t @ wih_t + h @ whh_t + bias
            i_g = jax.nn.sigmoid(gates[:, 0 * H:1 * H])
            f_g = jax.nn.sigmoid(gates[:, 1 * H:2 * H])
            g_g = jnp.tanh(gates[:, 2 * H:3 * H])
            o_g = jax.nn.sigmoid(gates[:, 3 * H:4 * H])
            c_new = f_g * c + i_g * g_g
            h_new = o_g * jnp.tanh(c_new)
            return (h_new, c_new), h_new

        (h_n, c_n), ys = lax.scan(step, (h0[l], c0[l]), jnp.transpose(x, (1, 0, 2)))
        x = jnp.transpose(ys, (1, 0, 2))
        hns.append(h_n)
        cns.append(c_n)
    return x, (jnp.stack(hns, 0), jnp.stack(cns, 0))


# ----------------------------------------------------------------------------
# Deterministic parameter init (shapes match nn.LSTM; uniform ±1/sqrt(H)).
# ----------------------------------------------------------------------------
def init_lstm_params(key, input_size, hidden_size, num_layers):
    params = []
    bound = 1.0 / jnp.sqrt(jnp.float32(hidden_size))
    for l in range(num_layers):
        in_dim = input_size if l == 0 else hidden_size
        key, k1, k2, k3, k4 = jax.random.split(key, 5)
        params.append({
            "w_ih": jax.random.uniform(k1, (4 * hidden_size, in_dim),
                                       jnp.float32, -bound, bound),
            "w_hh": jax.random.uniform(k2, (4 * hidden_size, hidden_size),
                                       jnp.float32, -bound, bound),
            "b_ih": jax.random.uniform(k3, (4 * hidden_size,),
                                       jnp.float32, -bound, bound),
            "b_hh": jax.random.uniform(k4, (4 * hidden_size,),
                                       jnp.float32, -bound, bound),
        })
    return params


if __name__ == "__main__":
    # Small shapes consistent with the module's forward signature.
    batch, seq_len = 2, 8
    input_size, hidden_size, num_layers, num_actions = 16, 32, 2, 4  # num_actions unused in forward

    key = jax.random.PRNGKey(0)
    k_x, k_h, k_c, k_p = jax.random.split(key, 4)

    inputs = jax.random.normal(k_x, (batch, seq_len, input_size), jnp.float32)
    h0 = jax.random.normal(k_h, (num_layers, batch, hidden_size), jnp.float32)
    c0 = jax.random.normal(k_c, (num_layers, batch, hidden_size), jnp.float32)
    params = init_lstm_params(k_p, input_size, hidden_size, num_layers)

    output, (h_n, c_n) = lstm_actor_forward(inputs, h0, c0, params)
    jax.block_until_ready((output, h_n, c_n))

    # Sanity check against pure-JAX reference.  Tolerance is slightly above
    # 1e-5 because the kernel recovers tanh(g) via 2*sigmoid(2g)-1 (exact in
    # infinite precision, ~1e-7 per-element in f32, accumulated over T*L steps).
    ref_out, (ref_hn, ref_cn) = lstm_actor_reference(inputs, h0, c0, params)
    assert output.shape == (batch, seq_len, hidden_size)
    assert h_n.shape == (num_layers, batch, hidden_size)
    assert c_n.shape == (num_layers, batch, hidden_size)
    assert jnp.allclose(output, ref_out, atol=2e-5, rtol=2e-5)
    assert jnp.allclose(h_n, ref_hn, atol=2e-5, rtol=2e-5)
    assert jnp.allclose(c_n, ref_cn, atol=2e-5, rtol=2e-5)

    print("KERNEL_OK")
</pallas_src>

<mosaic_0001>
module attributes {stable_mosaic.version = 11 : i64} {
  func.func @kernel(%arg0: memref<16x16xf32, #tpu.memory_space<vmem>>, %arg1: memref<16x128xf32, #tpu.memory_space<vmem>>, %arg2: memref<32x128xf32, #tpu.memory_space<vmem>>, %arg3: memref<1x128xf32, #tpu.memory_space<vmem>>, %arg4: memref<32x128xf32, #tpu.memory_space<vmem>>, %arg5: memref<32x128xf32, #tpu.memory_space<vmem>>, %arg6: memref<1x128xf32, #tpu.memory_space<vmem>>, %arg7: memref<2x2x32xf32, #tpu.memory_space<vmem>>, %arg8: memref<2x2x32xf32, #tpu.memory_space<vmem>>, %arg9: memref<16x32xf32, #tpu.memory_space<vmem>>, %arg10: memref<2x2x32xf32, #tpu.memory_space<vmem>>, %arg11: memref<2x2x32xf32, #tpu.memory_space<vmem>>, %arg12: memref<16x128xf32, #tpu.memory_space<vmem>>) attributes {dimension_semantics = [], scalar_prefetch = 0 : i64, scratch_operands = 1 : i64, tpu.core_type = #tpu.core_type<tc>} {
    %0 = tpu.iota {dimensions = array<i32: 1>} : vector<2x128xi32>
    %c96_i32 = arith.constant 96 : i32
    %1 = vector.broadcast %c96_i32 : i32 to vector<2x128xi32>
    %2 = arith.cmpi sge, %0, %1 : vector<2x128xi32>
    %c0 = arith.constant 0 : index
    %c0_0 = arith.constant 0 : index
    %3 = vector.load %arg1[%c0, %c0_0] : memref<16x128xf32, #tpu.memory_space<vmem>>, vector<16x128xf32>
    %c0_1 = arith.constant 0 : index
    %c0_2 = arith.constant 0 : index
    %4 = vector.load %arg2[%c0_1, %c0_2] : memref<32x128xf32, #tpu.memory_space<vmem>>, vector<32x128xf32>
    %c0_3 = arith.constant 0 : index
    %c0_4 = arith.constant 0 : index
    %5 = vector.load %arg3[%c0_3, %c0_4] : memref<1x128xf32, #tpu.memory_space<vmem>>, vector<1x128xf32>
    %c0_5 = arith.constant 0 : index
    %c0_6 = arith.constant 0 : index
    %6 = vector.load %arg0[%c0_5, %c0_6] : memref<16x16xf32, #tpu.memory_space<vmem>>, vector<16x16xf32>
    %cst = arith.constant dense<0.000000e+00> : vector<16x128xf32>
    %7 = tpu.matmul %6, %3, %cst {dimension_numbers = #tpu.dot_dimension_numbers<[1], [0], [0], [1], [0, 0, 1, 1], [], []>} : vector<16x16xf32>, vector<16x128xf32>, vector<16x128xf32> -> vector<16x128xf32>
    %8 = vector.broadcast %5 : vector<1x128xf32> to vector<16x128xf32>
    %9 = arith.addf %7, %8 : vector<16x128xf32>
    %c0_7 = arith.constant 0 : index
    %c0_8 = arith.constant 0 : index
    %10 = vector.load %arg12[%c0_7, %c0_8] : memref<16x128xf32, #tpu.memory_space<vmem>>, vector<16x128xf32>
    tpu.vector_store %arg12[%c0_7, %c0_8], %9 {strides = array<i32>} : memref<16x128xf32, #tpu.memory_space<vmem>>, vector<16x128xf32>,
    %c0_9 = arith.constant 0 : index
    %c0_10 = arith.constant 0 : index
    %c0_11 = arith.constant 0 : index
    %11 = vector.load %arg7[%c0_9, %c0_10, %c0_11] : memref<2x2x32xf32, #tpu.memory_space<vmem>>, vector<1x2x32xf32>
    %12 = vector.shape_cast %11 : vector<1x2x32xf32> to vector<2x32xf32>
    %c0_12 = arith.constant 0 : index
    %c0_13 = arith.constant 0 : index
    %c0_14 = arith.constant 0 : index
    %13 = vector.load %arg8[%c0_12, %c0_13, %c0_14] : memref<2x2x32xf32, #tpu.memory_space<vmem>>, vector<1x2x32xf32>
    %14 = vector.shape_cast %13 : vector<1x2x32xf32> to vector<2x32xf32>
    %c0_15 = arith.constant 0 : index
    %c0_16 = arith.constant 0 : index
    %15 = vector.load %arg12[%c0_15, %c0_16] : memref<16x128xf32, #tpu.memory_space<vmem>>, vector<2x128xf32>
    %cst_17 = arith.constant dense<0.000000e+00> : vector<2x128xf32>
    %16 = tpu.matmul %12, %4, %cst_17 {dimension_numbers = #tpu.dot_dimension_numbers<[1], [0], [0], [1], [0, 0, 1, 1], [], []>} : vector<2x32xf32>, vector<32x128xf32>, vector<2x128xf32> -> vector<2x128xf32>
    %17 = arith.addf %15, %16 : vector<2x128xf32>
    %18 = arith.negf %17 : vector<2x128xf32>
    %19 = math.exp %18 : vector<2x128xf32>
    %cst_18 = arith.constant 1.000000e+00 : f32
    %20 = vector.broadcast %cst_18 : f32 to vector<2x128xf32>
    %21 = arith.addf %20, %19 : vector<2x128xf32>
    %22 = arith.divf %20, %21 : vector<2x128xf32>
    %cst_19 = arith.constant 2.000000e+00 : f32
    %23 = vector.broadcast %cst_19 : f32 to vector<2x128xf32>
    %24 = arith.mulf %23, %22 : vector<2x128xf32>
    %cst_20 = arith.constant 1.000000e+00 : f32
    %25 = vector.broadcast %cst_20 : f32 to vector<2x128xf32>
    %26 = arith.subf %24, %25 : vector<2x128xf32>
    %27 = arith.select %2, %26, %22 : vector<2x128xi1>, vector<2x128xf32>
    %28 = vector.extract_strided_slice %27 {offsets = [0, 0], sizes = [2, 32], strides = [1, 1]} : vector<2x128xf32> to vector<2x32xf32>
    %29 = vector.extract_strided_slice %27 {offsets = [0, 32], sizes = [2, 32], strides = [1, 1]} : vector<2x128xf32> to vector<2x32xf32>
    %30 = vector.extract_strided_slice %27 {offsets = [0, 64], sizes = [2, 32], strides = [1, 1]} : vector<2x128xf32> to vector<2x32xf32>
    %31 = vector.extract_strided_slice %27 {offsets = [0, 96], sizes = [2, 32], strides = [1, 1]} : vector<2x128xf32> to vector<2x32xf32>
    %32 = arith.mulf %29, %14 : vector<2x32xf32>
    %33 = arith.mulf %28, %31 : vector<2x32xf32>
    %34 = arith.addf %32, %33 : vector<2x32xf32>
    %35 = math.tanh %34 : vector<2x32xf32>
    %36 = arith.mulf %30, %35 : vector<2x32xf32>
    %c0_21 = arith.constant 0 : index
    %c0_22 = arith.constant 0 : index
    %37 = vector.load %arg9[%c0_21, %c0_22] : memref<16x32xf32, #tpu.memory_space<vmem>>, vector<2x32xf32>
    tpu.vector_store %arg9[%c0_21, %c0_22], %36 {strides = array<i32>} : memref<16x32xf32, #tpu.memory_space<vmem>>, vector<2x32xf32>,
    %c2 = arith.constant 2 : index
    %c0_23 = arith.constant 0 : index
    %38 = vector.load %arg12[%c2, %c0_23] : memref<16x128xf32, #tpu.memory_space<vmem>>, vector<2x128xf32>
    %cst_24 = arith.constant dense<0.000000e+00> : vector<2x128xf32>
    %39 = tpu.matmul %36, %4, %cst_24 {dimension_numbers = #tpu.dot_dimension_numbers<[1], [0], [0], [1], [0, 0, 1, 1], [], []>} : vector<2x32xf32>, vector<32x128xf32>, vector<2x128xf32> -> vector<2x128xf32>
    %40 = arith.addf %38, %39 : vector<2x128xf32>
    %41 = arith.negf %40 : vector<2x128xf32>
    %42 = math.exp %41 : vector<2x128xf32>
    %cst_25 = arith.constant 1.000000e+00 : f32
    %43 = vector.broadcast %cst_25 : f32 to vector<2x128xf32>
    %44 = arith.addf %43, %42 : vector<2x128xf32>
    %45 = arith.divf %43, %44 : vector<2x128xf32>
    %cst_26 = arith.constant 2.000000e+00 : f32
    %46 = vector.broadcast %cst_26 : f32 to vector<2x128xf32>
    %47 = arith.mulf %46, %45 : vector<2x128xf32>
    %cst_27 = arith.constant 1.000000e+00 : f32
    %48 = vector.broadcast %cst_27 : f32 to vector<2x128xf32>
    %49 = arith.subf %47, %48 : vector<2x128xf32>
    %50 = arith.select %2, %49, %45 : vector<2x128xi1>, vector<2x128xf32>
    %51 = vector.extract_strided_slice %50 {offsets = [0, 0], sizes = [2, 32], strides = [1, 1]} : vector<2x128xf32> to vector<2x32xf32>
    %52 = vector.extract_strided_slice %50 {offsets = [0, 32], sizes = [2, 32], strides = [1, 1]} : vector<2x128xf32> to vector<2x32xf32>
    %53 = vector.extract_strided_slice %50 {offsets = [0, 64], sizes = [2, 32], strides = [1, 1]} : vector<2x128xf32> to vector<2x32xf32>
    %54 = vector.extract_strided_slice %50 {offsets = [0, 96], sizes = [2, 32], strides = [1, 1]} : vector<2x128xf32> to vector<2x32xf32>
    %55 = arith.mulf %52, %34 : vector<2x32xf32>
    %56 = arith.mulf %51, %54 : vector<2x32xf32>
    %57 = arith.addf %55, %56 : vector<2x32xf32>
    %58 = math.tanh %57 : vector<2x32xf32>
    %59 = arith.mulf %53, %58 : vector<2x32xf32>
    %c2_28 = arith.constant 2 : index
    %c0_29 = arith.constant 0 : index
    %60 = vector.load %arg9[%c2_28, %c0_29] : memref<16x32xf32, #tpu.memory_space<vmem>>, vector<2x32xf32>
    tpu.vector_store %arg9[%c2_28, %c0_29], %59 {strides = array<i32>} : memref<16x32xf32, #tpu.memory_space<vmem>>, vector<2x32xf32>,
    %c4 = arith.constant 4 : index
    %c0_30 = arith.constant 0 : index
    %61 = vector.load %arg12[%c4, %c0_30] : memref<16x128xf32, #tpu.memory_space<vmem>>, vector<2x128xf32>
    %cst_31 = arith.constant dense<0.000000e+00> : vector<2x128xf32>
    %62 = tpu.matmul %59, %4, %cst_31 {dimension_numbers = #tpu.dot_dimension_numbers<[1], [0], [0], [1], [0, 0, 1, 1], [], []>} : vector<2x32xf32>, vector<32x128xf32>, vector<2x128xf32> -> vector<2x128xf32>
    %63 = arith.addf %61, %62 : vector<2x128xf32>
    %64 = arith.negf %63 : vector<2x128xf32>
    %65 = math.exp %64 : vector<2x128xf32>
    %cst_32 = arith.constant 1.000000e+00 : f32
    %66 = vector.broadcast %cst_32 : f32 to vector<2x128xf32>
    %67 = arith.addf %66, %65 : vector<2x128xf32>
    %68 = arith.divf %66, %67 : vector<2x128xf32>
    %cst_33 = arith.constant 2.000000e+00 : f32
    %69 = vector.broadcast %cst_33 : f32 to vector<2x128xf32>
    %70 = arith.mulf %69, %68 : vector<2x128xf32>
    %cst_34 = arith.constant 1.000000e+00 : f32
    %71 = vector.broadcast %cst_34 : f32 to vector<2x128xf32>
    %72 = arith.subf %70, %71 : vector<2x128xf32>
    %73 = arith.select %2, %72, %68 : vector<2x128xi1>, vector<2x128xf32>
    %74 = vector.extract_strided_slice %73 {offsets = [0, 0], sizes = [2, 32], strides = [1, 1]} : vector<2x128xf32> to vector<2x32xf32>
    %75 = vector.extract_strided_slice %73 {offsets = [0, 32], sizes = [2, 32], strides = [1, 1]} : vector<2x128xf32> to vector<2x32xf32>
    %76 = vector.extract_strided_slice %73 {offsets = [0, 64], sizes = [2, 32], strides = [1, 1]} : vector<2x128xf32> to vector<2x32xf32>
    %77 = vector.extract_strided_slice %73 {offsets = [0, 96], sizes = [2, 32], strides = [1, 1]} : vector<2x128xf32> to vector<2x32xf32>
    %78 = arith.mulf %75, %57 : vector<2x32xf32>
    %79 = arith.mulf %74, %77 : vector<2x32xf32>
    %80 = arith.addf %78, %79 : vector<2x32xf32>
    %81 = math.tanh %80 : vector<2x32xf32>
    %82 = arith.mulf %76, %81 : vector<2x32xf32>
    %c4_35 = arith.constant 4 : index
    %c0_36 = arith.constant 0 : index
    %83 = vector.load %arg9[%c4_35, %c0_36] : memref<16x32xf32, #tpu.memory_space<vmem>>, vector<2x32xf32>
    tpu.vector_store %arg9[%c4_35, %c0_36], %82 {strides = array<i32>} : memref<16x32xf32, #tpu.memory_space<vmem>>, vector<2x32xf32>,
    %c6 = arith.constant 6 : index
    %c0_37 = arith.constant 0 : index
    %84 = vector.load %arg12[%c6, %c0_37] : memref<16x128xf32, #tpu.memory_space<vmem>>, vector<2x128xf32>
    %cst_38 = arith.constant dense<0.000000e+00> : vector<2x128xf32>
    %85 = tpu.matmul %82, %4, %cst_38 {dimension_numbers = #tpu.dot_dimension_numbers<[1], [0], [0], [1], [0, 0, 1, 1], [], []>} : vector<2x32xf32>, vector<32x128xf32>, vector<2x128xf32> -> vector<2x128xf32>
    %86 = arith.addf %84, %85 : vector<2x128xf32>
    %87 = arith.negf %86 : vector<2x128xf32>
    %88 = math.exp %87 : vector<2x128xf32>
    %cst_39 = arith.constant 1.000000e+00 : f32
    %89 = vector.broadcast %cst_39 : f32 to vector<2x128xf32>
    %90 = arith.addf %89, %88 : vector<2x128xf32>
    %91 = arith.divf %89, %90 : vector<2x128xf32>
    %cst_40 = arith.constant 2.000000e+00 : f32
    %92 = vector.broadcast %cst_40 : f32 to vector<2x128xf32>
    %93 = arith.mulf %92, %91 : vector<2x128xf32>
    %cst_41 = arith.constant 1.000000e+00 : f32
    %94 = vector.broadcast %cst_41 : f32 to vector<2x128xf32>
    %95 = arith.subf %93, %94 : vector<2x128xf32>
    %96 = arith.select %2, %95, %91 : vector<2x128xi1>, vector<2x128xf32>
    %97 = vector.extract_strided_slice %96 {offsets = [0, 0], sizes = [2, 32], strides = [1, 1]} : vector<2x128xf32> to vector<2x32xf32>
    %98 = vector.extract_strided_slice %96 {offsets = [0, 32], sizes = [2, 32], strides = [1, 1]} : vector<2x128xf32> to vector<2x32xf32>
    %99 = vector.extract_strided_slice %96 {offsets = [0, 64], sizes = [2, 32], strides = [1, 1]} : vector<2x128xf32> to vector<2x32xf32>
    %100 = vector.extract_strided_slice %96 {offsets = [0, 96], sizes = [2, 32], strides = [1, 1]} : vector<2x128xf32> to vector<2x32xf32>
    %101 = arith.mulf %98, %80 : vector<2x32xf32>
    %102 = arith.mulf %97, %100 : vector<2x32xf32>
    %103 = arith.addf %101, %102 : vector<2x32xf32>
    %104 = math.tanh %103 : vector<2x32xf32>
    %105 = arith.mulf %99, %104 : vector<2x32xf32>
    %c6_42 = arith.constant 6 : index
    %c0_43 = arith.constant 0 : index
    %106 = vector.load %arg9[%c6_42, %c0_43] : memref<16x32xf32, #tpu.memory_space<vmem>>, vector<2x32xf32>
    tpu.vector_store %arg9[%c6_42, %c0_43], %105 {strides = array<i32>} : memref<16x32xf32, #tpu.memory_space<vmem>>, vector<2x32xf32>,
    %c8 = arith.constant 8 : index
    %c0_44 = arith.constant 0 : index
    %107 = vector.load %arg12[%c8, %c0_44] : memref<16x128xf32, #tpu.memory_space<vmem>>, vector<2x128xf32>
    %cst_45 = arith.constant dense<0.000000e+00> : vector<2x128xf32>
    %108 = tpu.matmul %105, %4, %cst_45 {dimension_numbers = #tpu.dot_dimension_numbers<[1], [0], [0], [1], [0, 0, 1, 1], [], []>} : vector<2x32xf32>, vector<32x128xf32>, vector<2x128xf32> -> vector<2x128xf32>
    %109 = arith.addf %107, %108 : vector<2x128xf32>
    %110 = arith.negf %109 : vector<2x128xf32>
    %111 = math.exp %110 : vector<2x128xf32>
    %cst_46 = arith.constant 1.000000e+00 : f32
    %112 = vector.broadcast %cst_46 : f32 to vector<2x128xf32>
    %113 = arith.addf %112, %111 : vector<2x128xf32>
    %114 = arith.divf %112, %113 : vector<2x128xf32>
    %cst_47 = arith.constant 2.000000e+00 : f32
    %115 = vector.broadcast %cst_47 : f32 to vector<2x128xf32>
    %116 = arith.mulf %115, %114 : vector<2x128xf32>
    %cst_48 = arith.constant 1.000000e+00 : f32
    %117 = vector.broadcast %cst_48 : f32 to vector<2x128xf32>
    %118 = arith.subf %116, %117 : vector<2x128xf32>
    %119 = arith.select %2, %118, %114 : vector<2x128xi1>, vector<2x128xf32>
    %120 = vector.extract_strided_slice %119 {offsets = [0, 0], sizes = [2, 32], strides = [1, 1]} : vector<2x128xf32> to vector<2x32xf32>
    %121 = vector.extract_strided_slice %119 {offsets = [0, 32], sizes = [2, 32], strides = [1, 1]} : vector<2x128xf32> to vector<2x32xf32>
    %122 = vector.extract_strided_slice %119 {offsets = [0, 64], sizes = [2, 32], strides = [1, 1]} : vector<2x128xf32> to vector<2x32xf32>
    %123 = vector.extract_strided_slice %119 {offsets = [0, 96], sizes = [2, 32], strides = [1, 1]} : vector<2x128xf32> to vector<2x32xf32>
    %124 = arith.mulf %121, %103 : vector<2x32xf32>
    %125 = arith.mulf %120, %123 : vector<2x32xf32>
    %126 = arith.addf %124, %125 : vector<2x32xf32>
    %127 = math.tanh %126 : vector<2x32xf32>
    %128 = arith.mulf %122, %127 : vector<2x32xf32>
    %c8_49 = arith.constant 8 : index
    %c0_50 = arith.constant 0 : index
    %129 = vector.load %arg9[%c8_49, %c0_50] : memref<16x32xf32, #tpu.memory_space<vmem>>, vector<2x32xf32>
    tpu.vector_store %arg9[%c8_49, %c0_50], %128 {strides = array<i32>} : memref<16x32xf32, #tpu.memory_space<vmem>>, vector<2x32xf32>,
    %c10 = arith.constant 10 : index
    %c0_51 = arith.constant 0 : index
    %130 = vector.load %arg12[%c10, %c0_51] : memref<16x128xf32, #tpu.memory_space<vmem>>, vector<2x128xf32>
    %cst_52 = arith.constant dense<0.000000e+00> : vector<2x128xf32>
    %131 = tpu.matmul %128, %4, %cst_52 {dimension_numbers = #tpu.dot_dimension_numbers<[1], [0], [0], [1], [0, 0, 1, 1], [], []>} : vector<2x32xf32>, vector<32x128xf32>, vector<2x128xf32> -> vector<2x128xf32>
    %132 = arith.addf %130, %131 : vector<2x128xf32>
    %133 = arith.negf %132 : vector<2x128xf32>
    %134 = math.exp %133 : vector<2x128xf32>
    %cst_53 = arith.constant 1.000000e+00 : f32
    %135 = vector.broadcast %cst_53 : f32 to vector<2x128xf32>
    %136 = arith.addf %135, %134 : vector<2x128xf32>
    %137 = arith.divf %135, %136 : vector<2x128xf32>
    %cst_54 = arith.constant 2.000000e+00 : f32
    %138 = vector.broadcast %cst_54 : f32 to vector<2x128xf32>
    %139 = arith.mulf %138, %137 : vector<2x128xf32>
    %cst_55 = arith.constant 1.000000e+00 : f32
    %140 = vector.broadcast %cst_55 : f32 to vector<2x128xf32>
    %141 = arith.subf %139, %140 : vector<2x128xf32>
    %142 = arith.select %2, %141, %137 : vector<2x128xi1>, vector<2x128xf32>
    %143 = vector.extract_strided_slice %142 {offsets = [0, 0], sizes = [2, 32], strides = [1, 1]} : vector<2x128xf32> to vector<2x32xf32>
    %144 = vector.extract_strided_slice %142 {offsets = [0, 32], sizes = [2, 32], strides = [1, 1]} : vector<2x128xf32> to vector<2x32xf32>
    %145 = vector.extract_strided_slice %142 {offsets = [0, 64], sizes = [2, 32], strides = [1, 1]} : vector<2x128xf32> to vector<2x32xf32>
    %146 = vector.extract_strided_slice %142 {offsets = [0, 96], sizes = [2, 32], strides = [1, 1]} : vector<2x128xf32> to vector<2x32xf32>
    %147 = arith.mulf %144, %126 : vector<2x32xf32>
    %148 = arith.mulf %143, %146 : vector<2x32xf32>
    %149 = arith.addf %147, %148 : vector<2x32xf32>
    %150 = math.tanh %149 : vector<2x32xf32>
    %151 = arith.mulf %145, %150 : vector<2x32xf32>
    %c10_56 = arith.constant 10 : index
    %c0_57 = arith.constant 0 : index
    %152 = vector.load %arg9[%c10_56, %c0_57] : memref<16x32xf32, #tpu.memory_space<vmem>>, vector<2x32xf32>
    tpu.vector_store %arg9[%c10_56, %c0_57], %151 {strides = array<i32>} : memref<16x32xf32, #tpu.memory_space<vmem>>, vector<2x32xf32>,
    %c12 = arith.constant 12 : index
    %c0_58 = arith.constant 0 : index
    %153 = vector.load %arg12[%c12, %c0_58] : memref<16x128xf32, #tpu.memory_space<vmem>>, vector<2x128xf32>
    %cst_59 = arith.constant dense<0.000000e+00> : vector<2x128xf32>
    %154 = tpu.matmul %151, %4, %cst_59 {dimension_numbers = #tpu.dot_dimension_numbers<[1], [0], [0], [1], [0, 0, 1, 1], [], []>} : vector<2x32xf32>, vector<32x128xf32>, vector<2x128xf32> -> vector<2x128xf32>
    %155 = arith.addf %153, %154 : vector<2x128xf32>
    %156 = arith.negf %155 : vector<2x128xf32>
    %157 = math.exp %156 : vector<2x128xf32>
    %cst_60 = arith.constant 1.000000e+00 : f32
    %158 = vector.broadcast %cst_60 : f32 to vector<2x128xf32>
    %159 = arith.addf %158, %157 : vector<2x128xf32>
    %160 = arith.divf %158, %159 : vector<2x128xf32>
    %cst_61 = arith.constant 2.000000e+00 : f32
    %161 = vector.broadcast %cst_61 : f32 to vector<2x128xf32>
    %162 = arith.mulf %161, %160 : vector<2x128xf32>
    %cst_62 = arith.constant 1.000000e+00 : f32
    %163 = vector.broadcast %cst_62 : f32 to vector<2x128xf32>
    %164 = arith.subf %162, %163 : vector<2x128xf32>
    %165 = arith.select %2, %164, %160 : vector<2x128xi1>, vector<2x128xf32>
    %166 = vector.extract_strided_slice %165 {offsets = [0, 0], sizes = [2, 32], strides = [1, 1]} : vector<2x128xf32> to vector<2x32xf32>
    %167 = vector.extract_strided_slice %165 {offsets = [0, 32], sizes = [2, 32], strides = [1, 1]} : vector<2x128xf32> to vector<2x32xf32>
    %168 = vector.extract_strided_slice %165 {offsets = [0, 64], sizes = [2, 32], strides = [1, 1]} : vector<2x128xf32> to vector<2x32xf32>
    %169 = vector.extract_strided_slice %165 {offsets = [0, 96], sizes = [2, 32], strides = [1, 1]} : vector<2x128xf32> to vector<2x32xf32>
    %170 = arith.mulf %167, %149 : vector<2x32xf32>
    %171 = arith.mulf %166, %169 : vector<2x32xf32>
    %172 = arith.addf %170, %171 : vector<2x32xf32>
    %173 = math.tanh %172 : vector<2x32xf32>
    %174 = arith.mulf %168, %173 : vector<2x32xf32>
    %c12_63 = arith.constant 12 : index
    %c0_64 = arith.constant 0 : index
    %175 = vector.load %arg9[%c12_63, %c0_64] : memref<16x32xf32, #tpu.memory_space<vmem>>, vector<2x32xf32>
    tpu.vector_store %arg9[%c12_63, %c0_64], %174 {strides = array<i32>} : memref<16x32xf32, #tpu.memory_space<vmem>>, vector<2x32xf32>,
    %c14 = arith.constant 14 : index
    %c0_65 = arith.constant 0 : index
    %176 = vector.load %arg12[%c14, %c0_65] : memref<16x128xf32, #tpu.memory_space<vmem>>, vector<2x128xf32>
    %cst_66 = arith.constant dense<0.000000e+00> : vector<2x128xf32>
    %177 = tpu.matmul %174, %4, %cst_66 {dimension_numbers = #tpu.dot_dimension_numbers<[1], [0], [0], [1], [0, 0, 1, 1], [], []>} : vector<2x32xf32>, vector<32x128xf32>, vector<2x128xf32> -> vector<2x128xf32>
    %178 = arith.addf %176, %177 : vector<2x128xf32>
    %179 = arith.negf %178 : vector<2x128xf32>
    %180 = math.exp %179 : vector<2x128xf32>
    %cst_67 = arith.constant 1.000000e+00 : f32
    %181 = vector.broadcast %cst_67 : f32 to vector<2x128xf32>
    %182 = arith.addf %181, %180 : vector<2x128xf32>
    %183 = arith.divf %181, %182 : vector<2x128xf32>
    %cst_68 = arith.constant 2.000000e+00 : f32
    %184 = vector.broadcast %cst_68 : f32 to vector<2x128xf32>
    %185 = arith.mulf %184, %183 : vector<2x128xf32>
    %cst_69 = arith.constant 1.000000e+00 : f32
    %186 = vector.broadcast %cst_69 : f32 to vector<2x128xf32>
    %187 = arith.subf %185, %186 : vector<2x128xf32>
    %188 = arith.select %2, %187, %183 : vector<2x128xi1>, vector<2x128xf32>
    %189 = vector.extract_strided_slice %188 {offsets = [0, 0], sizes = [2, 32], strides = [1, 1]} : vector<2x128xf32> to vector<2x32xf32>
    %190 = vector.extract_strided_slice %188 {offsets = [0, 32], sizes = [2, 32], strides = [1, 1]} : vector<2x128xf32> to vector<2x32xf32>
    %191 = vector.extract_strided_slice %188 {offsets = [0, 64], sizes = [2, 32], strides = [1, 1]} : vector<2x128xf32> to vector<2x32xf32>
    %192 = vector.extract_strided_slice %188 {offsets = [0, 96], sizes = [2, 32], strides = [1, 1]} : vector<2x128xf32> to vector<2x32xf32>
    %193 = arith.mulf %190, %172 : vector<2x32xf32>
    %194 = arith.mulf %189, %192 : vector<2x32xf32>
    %195 = arith.addf %193, %194 : vector<2x32xf32>
    %196 = math.tanh %195 : vector<2x32xf32>
    %197 = arith.mulf %191, %196 : vector<2x32xf32>
    %c14_70 = arith.constant 14 : index
    %c0_71 = arith.constant 0 : index
    %198 = vector.load %arg9[%c14_70, %c0_71] : memref<16x32xf32, #tpu.memory_space<vmem>>, vector<2x32xf32>
    tpu.vector_store %arg9[%c14_70, %c0_71], %197 {strides = array<i32>} : memref<16x32xf32, #tpu.memory_space<vmem>>, vector<2x32xf32>,
    %c0_72 = arith.constant 0 : index
    %c0_73 = arith.constant 0 : index
    %c0_74 = arith.constant 0 : index
    %199 = vector.load %arg10[%c0_72, %c0_73, %c0_74] : memref<2x2x32xf32, #tpu.memory_space<vmem>>, vector<1x2x32xf32>
    %200 = vector.shape_cast %199 : vector<1x2x32xf32> to vector<2x32xf32>
    %201 = vector.shape_cast %197 : vector<2x32xf32> to vector<1x2x32xf32>
    tpu.vector_store %arg10[%c0_72, %c0_73, %c0_74], %201 {strides = array<i32>} : memref<2x2x32xf32, #tpu.memory_space<vmem>>, vector<1x2x32xf32>,
    %c0_75 = arith.constant 0 : index
    %c0_76 = arith.constant 0 : index
    %c0_77 = arith.constant 0 : index
    %202 = vector.load %arg11[%c0_75, %c0_76, %c0_77] : memref<2x2x32xf32, #tpu.memory_space<vmem>>, vector<1x2x32xf32>
    %203 = vector.shape_cast %202 : vector<1x2x32xf32> to vector<2x32xf32>
    %204 = vector.shape_cast %195 : vector<2x32xf32> to vector<1x2x32xf32>
    tpu.vector_store %arg11[%c0_75, %c0_76, %c0_77], %204 {strides = array<i32>} : memref<2x2x32xf32, #tpu.memory_space<vmem>>, vector<1x2x32xf32>,
    %c0_78 = arith.constant 0 : index
    %c0_79 = arith.constant 0 : index
    %205 = vector.load %arg4[%c0_78, %c0_79] : memref<32x128xf32, #tpu.memory_space<vmem>>, vector<32x128xf32>
    %c0_80 = arith.constant 0 : index
    %c0_81 = arith.constant 0 : index
    %206 = vector.load %arg5[%c0_80, %c0_81] : memref<32x128xf32, #tpu.memory_space<vmem>>, vector<32x128xf32>
    %c0_82 = arith.constant 0 : index
    %c0_83 = arith.constant 0 : index
    %207 = vector.load %arg6[%c0_82, %c0_83] : memref<1x128xf32, #tpu.memory_space<vmem>>, vector<1x128xf32>
    %c0_84 = arith.constant 0 : index
    %c0_85 = arith.constant 0 : index
    %208 = vector.load %arg9[%c0_84, %c0_85] : memref<16x32xf32, #tpu.memory_space<vmem>>, vector<16x32xf32>
    %cst_86 = arith.constant dense<0.000000e+00> : vector<16x128xf32>
    %209 = tpu.matmul %208, %205, %cst_86 {dimension_numbers = #tpu.dot_dimension_numbers<[1], [0], [0], [1], [0, 0, 1, 1], [], []>} : vector<16x32xf32>, vector<32x128xf32>, vector<16x128xf32> -> vector<16x128xf32>
    %210 = vector.broadcast %207 : vector<1x128xf32> to vector<16x128xf32>
    %211 = arith.addf %209, %210 : vector<16x128xf32>
    %c0_87 = arith.constant 0 : index
    %c0_88 = arith.constant 0 : index
    %212 = vector.load %arg12[%c0_87, %c0_88] : memref<16x128xf32, #tpu.memory_space<vmem>>, vector<16x128xf32>
    tpu.vector_store %arg12[%c0_87, %c0_88], %211 {strides = array<i32>} : memref<16x128xf32, #tpu.memory_space<vmem>>, vector<16x128xf32>,
    %c1 = arith.constant 1 : index
    %c0_89 = arith.constant 0 : index
    %c0_90 = arith.constant 0 : index
    %213 = vector.load %arg7[%c1, %c0_89, %c0_90] : memref<2x2x32xf32, #tpu.memory_space<vmem>>, vector<1x2x32xf32>
    %214 = vector.shape_cast %213 : vector<1x2x32xf32> to vector<2x32xf32>
    %c1_91 = arith.constant 1 : index
    %c0_92 = arith.constant 0 : index
    %c0_93 = arith.constant 0 : index
    %215 = vector.load %arg8[%c1_91, %c0_92, %c0_93] : memref<2x2x32xf32, #tpu.memory_space<vmem>>, vector<1x2x32xf32>
    %216 = vector.shape_cast %215 : vector<1x2x32xf32> to vector<2x32xf32>
    %c0_94 = arith.constant 0 : index
    %c0_95 = arith.constant 0 : index
    %217 = vector.load %arg12[%c0_94, %c0_95] : memref<16x128xf32, #tpu.memory_space<vmem>>, vector<2x128xf32>
    %cst_96 = arith.constant dense<0.000000e+00> : vector<2x128xf32>
    %218 = tpu.matmul %214, %206, %cst_96 {dimension_numbers = #tpu.dot_dimension_numbers<[1], [0], [0], [1], [0, 0, 1, 1], [], []>} : vector<2x32xf32>, vector<32x128xf32>, vector<2x128xf32> -> vector<2x128xf32>
    %219 = arith.addf %217, %218 : vector<2x128xf32>
    %220 = arith.negf %219 : vector<2x128xf32>
    %221 = math.exp %220 : vector<2x128xf32>
    %cst_97 = arith.constant 1.000000e+00 : f32
    %222 = vector.broadcast %cst_97 : f32 to vector<2x128xf32>
    %223 = arith.addf %222, %221 : vector<2x128xf32>
    %224 = arith.divf %222, %223 : vector<2x128xf32>
    %cst_98 = arith.constant 2.000000e+00 : f32
    %225 = vector.broadcast %cst_98 : f32 to vector<2x128xf32>
    %226 = arith.mulf %225, %224 : vector<2x128xf32>
    %cst_99 = arith.constant 1.000000e+00 : f32
    %227 = vector.broadcast %cst_99 : f32 to vector<2x128xf32>
    %228 = arith.subf %226, %227 : vector<2x128xf32>
    %229 = arith.select %2, %228, %224 : vector<2x128xi1>, vector<2x128xf32>
    %230 = vector.extract_strided_slice %229 {offsets = [0, 0], sizes = [2, 32], strides = [1, 1]} : vector<2x128xf32> to vector<2x32xf32>
    %231 = vector.extract_strided_slice %229 {offsets = [0, 32], sizes = [2, 32], strides = [1, 1]} : vector<2x128xf32> to vector<2x32xf32>
    %232 = vector.extract_strided_slice %229 {offsets = [0, 64], sizes = [2, 32], strides = [1, 1]} : vector<2x128xf32> to vector<2x32xf32>
    %233 = vector.extract_strided_slice %229 {offsets = [0, 96], sizes = [2, 32], strides = [1, 1]} : vector<2x128xf32> to vector<2x32xf32>
    %234 = arith.mulf %231, %216 : vector<2x32xf32>
    %235 = arith.mulf %230, %233 : vector<2x32xf32>
    %236 = arith.addf %234, %235 : vector<2x32xf32>
    %237 = math.tanh %236 : vector<2x32xf32>
    %238 = arith.mulf %232, %237 : vector<2x32xf32>
    %c0_100 = arith.constant 0 : index
    %c0_101 = arith.constant 0 : index
    %239 = vector.load %arg9[%c0_100, %c0_101] : memref<16x32xf32, #tpu.memory_space<vmem>>, vector<2x32xf32>
    tpu.vector_store %arg9[%c0_100, %c0_101], %238 {strides = array<i32>} : memref<16x32xf32, #tpu.memory_space<vmem>>, vector<2x32xf32>,
    %c2_102 = arith.constant 2 : index
    %c0_103 = arith.constant 0 : index
    %240 = vector.load %arg12[%c2_102, %c0_103] : memref<16x128xf32, #tpu.memory_space<vmem>>, vector<2x128xf32>
    %cst_104 = arith.constant dense<0.000000e+00> : vector<2x128xf32>
    %241 = tpu.matmul %238, %206, %cst_104 {dimension_numbers = #tpu.dot_dimension_numbers<[1], [0], [0], [1], [0, 0, 1, 1], [], []>} : vector<2x32xf32>, vector<32x128xf32>, vector<2x128xf32> -> vector<2x128xf32>
    %242 = arith.addf %240, %241 : vector<2x128xf32>
    %243 = arith.negf %242 : vector<2x128xf32>
    %244 = math.exp %243 : vector<2x128xf32>
    %cst_105 = arith.constant 1.000000e+00 : f32
    %245 = vector.broadcast %cst_105 : f32 to vector<2x128xf32>
    %246 = arith.addf %245, %244 : vector<2x128xf32>
    %247 = arith.divf %245, %246 : vector<2x128xf32>
    %cst_106 = arith.constant 2.000000e+00 : f32
    %248 = vector.broadcast %cst_106 : f32 to vector<2x128xf32>
    %249 = arith.mulf %248, %247 : vector<2x128xf32>
    %cst_107 = arith.constant 1.000000e+00 : f32
    %250 = vector.broadcast %cst_107 : f32 to vector<2x128xf32>
    %251 = arith.subf %249, %250 : vector<2x128xf32>
    %252 = arith.select %2, %251, %247 : vector<2x128xi1>, vector<2x128xf32>
    %253 = vector.extract_strided_slice %252 {offsets = [0, 0], sizes = [2, 32], strides = [1, 1]} : vector<2x128xf32> to vector<2x32xf32>
    %254 = vector.extract_strided_slice %252 {offsets = [0, 32], sizes = [2, 32], strides = [1, 1]} : vector<2x128xf32> to vector<2x32xf32>
    %255 = vector.extract_strided_slice %252 {offsets = [0, 64], sizes = [2, 32], strides = [1, 1]} : vector<2x128xf32> to vector<2x32xf32>
    %256 = vector.extract_strided_slice %252 {offsets = [0, 96], sizes = [2, 32], strides = [1, 1]} : vector<2x128xf32> to vector<2x32xf32>
    %257 = arith.mulf %254, %236 : vector<2x32xf32>
    %258 = arith.mulf %253, %256 : vector<2x32xf32>
    %259 = arith.addf %257, %258 : vector<2x32xf32>
    %260 = math.tanh %259 : vector<2x32xf32>
    %261 = arith.mulf %255, %260 : vector<2x32xf32>
    %c2_108 = arith.constant 2 : index
    %c0_109 = arith.constant 0 : index
    %262 = vector.load %arg9[%c2_108, %c0_109] : memref<16x32xf32, #tpu.memory_space<vmem>>, vector<2x32xf32>
    tpu.vector_store %arg9[%c2_108, %c0_109], %261 {strides = array<i32>} : memref<16x32xf32, #tpu.memory_space<vmem>>, vector<2x32xf32>,
    %c4_110 = arith.constant 4 : index
    %c0_111 = arith.constant 0 : index
    %263 = vector.load %arg12[%c4_110, %c0_111] : memref<16x128xf32, #tpu.memory_space<vmem>>, vector<2x128xf32>
    %cst_112 = arith.constant dense<0.000000e+00> : vector<2x128xf32>
    %264 = tpu.matmul %261, %206, %cst_112 {dimension_numbers = #tpu.dot_dimension_numbers<[1], [0], [0], [1], [0, 0, 1, 1], [], []>} : vector<2x32xf32>, vector<32x128xf32>, vector<2x128xf32> -> vector<2x128xf32>
    %265 = arith.addf %263, %264 : vector<2x128xf32>
    %266 = arith.negf %265 : vector<2x128xf32>
    %267 = math.exp %266 : vector<2x128xf32>
    %cst_113 = arith.constant 1.000000e+00 : f32
    %268 = vector.broadcast %cst_113 : f32 to vector<2x128xf32>
    %269 = arith.addf %268, %267 : vector<2x128xf32>
    %270 = arith.divf %268, %269 : vector<2x128xf32>
    %cst_114 = arith.constant 2.000000e+00 : f32
    %271 = vector.broadcast %cst_114 : f32 to vector<2x128xf32>
    %272 = arith.mulf %271, %270 : vector<2x128xf32>
    %cst_115 = arith.constant 1.000000e+00 : f32
    %273 = vector.broadcast %cst_115 : f32 to vector<2x128xf32>
    %274 = arith.subf %272, %273 : vector<2x128xf32>
    %275 = arith.select %2, %274, %270 : vector<2x128xi1>, vector<2x128xf32>
    %276 = vector.extract_strided_slice %275 {offsets = [0, 0], sizes = [2, 32], strides = [1, 1]} : vector<2x128xf32> to vector<2x32xf32>
    %277 = vector.extract_strided_slice %275 {offsets = [0, 32], sizes = [2, 32], strides = [1, 1]} : vector<2x128xf32> to vector<2x32xf32>
    %278 = vector.extract_strided_slice %275 {offsets = [0, 64], sizes = [2, 32], strides = [1, 1]} : vector<2x128xf32> to vector<2x32xf32>
    %279 = vector.extract_strided_slice %275 {offsets = [0, 96], sizes = [2, 32], strides = [1, 1]} : vector<2x128xf32> to vector<2x32xf32>
    %280 = arith.mulf %277, %259 : vector<2x32xf32>
    %281 = arith.mulf %276, %279 : vector<2x32xf32>
    %282 = arith.addf %280, %281 : vector<2x32xf32>
    %283 = math.tanh %282 : vector<2x32xf32>
    %284 = arith.mulf %278, %283 : vector<2x32xf32>
    %c4_116 = arith.constant 4 : index
    %c0_117 = arith.constant 0 : index
    %285 = vector.load %arg9[%c4_116, %c0_117] : memref<16x32xf32, #tpu.memory_space<vmem>>, vector<2x32xf32>
    tpu.vector_store %arg9[%c4_116, %c0_117], %284 {strides = array<i32>} : memref<16x32xf32, #tpu.memory_space<vmem>>, vector<2x32xf32>,
    %c6_118 = arith.constant 6 : index
    %c0_119 = arith.constant 0 : index
    %286 = vector.load %arg12[%c6_118, %c0_119] : memref<16x128xf32, #tpu.memory_space<vmem>>, vector<2x128xf32>
    %cst_120 = arith.constant dense<0.000000e+00> : vector<2x128xf32>
    %287 = tpu.matmul %284, %206, %cst_120 {dimension_numbers = #tpu.dot_dimension_numbers<[1], [0], [0], [1], [0, 0, 1, 1], [], []>} : vector<2x32xf32>, vector<32x128xf32>, vector<2x128xf32> -> vector<2x128xf32>
    %288 = arith.addf %286, %287 : vector<2x128xf32>
    %289 = arith.negf %288 : vector<2x128xf32>
    %290 = math.exp %289 : vector<2x128xf32>
    %cst_121 = arith.constant 1.000000e+00 : f32
    %291 = vector.broadcast %cst_121 : f32 to vector<2x128xf32>
    %292 = arith.addf %291, %290 : vector<2x128xf32>
    %293 = arith.divf %291, %292 : vector<2x128xf32>
    %cst_122 = arith.constant 2.000000e+00 : f32
    %294 = vector.broadcast %cst_122 : f32 to vector<2x128xf32>
    %295 = arith.mulf %294, %293 : vector<2x128xf32>
    %cst_123 = arith.constant 1.000000e+00 : f32
    %296 = vector.broadcast %cst_123 : f32 to vector<2x128xf32>
    %297 = arith.subf %295, %296 : vector<2x128xf32>
    %298 = arith.select %2, %297, %293 : vector<2x128xi1>, vector<2x128xf32>
    %299 = vector.extract_strided_slice %298 {offsets = [0, 0], sizes = [2, 32], strides = [1, 1]} : vector<2x128xf32> to vector<2x32xf32>
    %300 = vector.extract_strided_slice %298 {offsets = [0, 32], sizes = [2, 32], strides = [1, 1]} : vector<2x128xf32> to vector<2x32xf32>
    %301 = vector.extract_strided_slice %298 {offsets = [0, 64], sizes = [2, 32], strides = [1, 1]} : vector<2x128xf32> to vector<2x32xf32>
    %302 = vector.extract_strided_slice %298 {offsets = [0, 96], sizes = [2, 32], strides = [1, 1]} : vector<2x128xf32> to vector<2x32xf32>
    %303 = arith.mulf %300, %282 : vector<2x32xf32>
    %304 = arith.mulf %299, %302 : vector<2x32xf32>
    %305 = arith.addf %303, %304 : vector<2x32xf32>
    %306 = math.tanh %305 : vector<2x32xf32>
    %307 = arith.mulf %301, %306 : vector<2x32xf32>
    %c6_124 = arith.constant 6 : index
    %c0_125 = arith.constant 0 : index
    %308 = vector.load %arg9[%c6_124, %c0_125] : memref<16x32xf32, #tpu.memory_space<vmem>>, vector<2x32xf32>
    tpu.vector_store %arg9[%c6_124, %c0_125], %307 {strides = array<i32>} : memref<16x32xf32, #tpu.memory_space<vmem>>, vector<2x32xf32>,
    %c8_126 = arith.constant 8 : index
    %c0_127 = arith.constant 0 : index
    %309 = vector.load %arg12[%c8_126, %c0_127] : memref<16x128xf32, #tpu.memory_space<vmem>>, vector<2x128xf32>
    %cst_128 = arith.constant dense<0.000000e+00> : vector<2x128xf32>
    %310 = tpu.matmul %307, %206, %cst_128 {dimension_numbers = #tpu.dot_dimension_numbers<[1], [0], [0], [1], [0, 0, 1, 1], [], []>} : vector<2x32xf32>, vector<32x128xf32>, vector<2x128xf32> -> vector<2x128xf32>
    %311 = arith.addf %309, %310 : vector<2x128xf32>
    %312 = arith.negf %311 : vector<2x128xf32>
    %313 = math.exp %312 : vector<2x128xf32>
    %cst_129 = arith.constant 1.000000e+00 : f32
    %314 = vector.broadcast %cst_129 : f32 to vector<2x128xf32>
    %315 = arith.addf %314, %313 : vector<2x128xf32>
    %316 = arith.divf %314, %315 : vector<2x128xf32>
    %cst_130 = arith.constant 2.000000e+00 : f32
    %317 = vector.broadcast %cst_130 : f32 to vector<2x128xf32>
    %318 = arith.mulf %317, %316 : vector<2x128xf32>
    %cst_131 = arith.constant 1.000000e+00 : f32
    %319 = vector.broadcast %cst_131 : f32 to vector<2x128xf32>
    %320 = arith.subf %318, %319 : vector<2x128xf32>
    %321 = arith.select %2, %320, %316 : vector<2x128xi1>, vector<2x128xf32>
    %322 = vector.extract_strided_slice %321 {offsets = [0, 0], sizes = [2, 32], strides = [1, 1]} : vector<2x128xf32> to vector<2x32xf32>
    %323 = vector.extract_strided_slice %321 {offsets = [0, 32], sizes = [2, 32], strides = [1, 1]} : vector<2x128xf32> to vector<2x32xf32>
    %324 = vector.extract_strided_slice %321 {offsets = [0, 64], sizes = [2, 32], strides = [1, 1]} : vector<2x128xf32> to vector<2x32xf32>
    %325 = vector.extract_strided_slice %321 {offsets = [0, 96], sizes = [2, 32], strides = [1, 1]} : vector<2x128xf32> to vector<2x32xf32>
    %326 = arith.mulf %323, %305 : vector<2x32xf32>
    %327 = arith.mulf %322, %325 : vector<2x32xf32>
    %328 = arith.addf %326, %327 : vector<2x32xf32>
    %329 = math.tanh %328 : vector<2x32xf32>
    %330 = arith.mulf %324, %329 : vector<2x32xf32>
    %c8_132 = arith.constant 8 : index
    %c0_133 = arith.constant 0 : index
    %331 = vector.load %arg9[%c8_132, %c0_133] : memref<16x32xf32, #tpu.memory_space<vmem>>, vector<2x32xf32>
    tpu.vector_store %arg9[%c8_132, %c0_133], %330 {strides = array<i32>} : memref<16x32xf32, #tpu.memory_space<vmem>>, vector<2x32xf32>,
    %c10_134 = arith.constant 10 : index
    %c0_135 = arith.constant 0 : index
    %332 = vector.load %arg12[%c10_134, %c0_135] : memref<16x128xf32, #tpu.memory_space<vmem>>, vector<2x128xf32>
    %cst_136 = arith.constant dense<0.000000e+00> : vector<2x128xf32>
    %333 = tpu.matmul %330, %206, %cst_136 {dimension_numbers = #tpu.dot_dimension_numbers<[1], [0], [0], [1], [0, 0, 1, 1], [], []>} : vector<2x32xf32>, vector<32x128xf32>, vector<2x128xf32> -> vector<2x128xf32>
    %334 = arith.addf %332, %333 : vector<2x128xf32>
    %335 = arith.negf %334 : vector<2x128xf32>
    %336 = math.exp %335 : vector<2x128xf32>
    %cst_137 = arith.constant 1.000000e+00 : f32
    %337 = vector.broadcast %cst_137 : f32 to vector<2x128xf32>
    %338 = arith.addf %337, %336 : vector<2x128xf32>
    %339 = arith.divf %337, %338 : vector<2x128xf32>
    %cst_138 = arith.constant 2.000000e+00 : f32
    %340 = vector.broadcast %cst_138 : f32 to vector<2x128xf32>
    %341 = arith.mulf %340, %339 : vector<2x128xf32>
    %cst_139 = arith.constant 1.000000e+00 : f32
    %342 = vector.broadcast %cst_139 : f32 to vector<2x128xf32>
    %343 = arith.subf %341, %342 : vector<2x128xf32>
    %344 = arith.select %2, %343, %339 : vector<2x128xi1>, vector<2x128xf32>
    %345 = vector.extract_strided_slice %344 {offsets = [0, 0], sizes = [2, 32], strides = [1, 1]} : vector<2x128xf32> to vector<2x32xf32>
    %346 = vector.extract_strided_slice %344 {offsets = [0, 32], sizes = [2, 32], strides = [1, 1]} : vector<2x128xf32> to vector<2x32xf32>
    %347 = vector.extract_strided_slice %344 {offsets = [0, 64], sizes = [2, 32], strides = [1, 1]} : vector<2x128xf32> to vector<2x32xf32>
    %348 = vector.extract_strided_slice %344 {offsets = [0, 96], sizes = [2, 32], strides = [1, 1]} : vector<2x128xf32> to vector<2x32xf32>
    %349 = arith.mulf %346, %328 : vector<2x32xf32>
    %350 = arith.mulf %345, %348 : vector<2x32xf32>
    %351 = arith.addf %349, %350 : vector<2x32xf32>
    %352 = math.tanh %351 : vector<2x32xf32>
    %353 = arith.mulf %347, %352 : vector<2x32xf32>
    %c10_140 = arith.constant 10 : index
    %c0_141 = arith.constant 0 : index
    %354 = vector.load %arg9[%c10_140, %c0_141] : memref<16x32xf32, #tpu.memory_space<vmem>>, vector<2x32xf32>
    tpu.vector_store %arg9[%c10_140, %c0_141], %353 {strides = array<i32>} : memref<16x32xf32, #tpu.memory_space<vmem>>, vector<2x32xf32>,
    %c12_142 = arith.constant 12 : index
    %c0_143 = arith.constant 0 : index
    %355 = vector.load %arg12[%c12_142, %c0_143] : memref<16x128xf32, #tpu.memory_space<vmem>>, vector<2x128xf32>
    %cst_144 = arith.constant dense<0.000000e+00> : vector<2x128xf32>
    %356 = tpu.matmul %353, %206, %cst_144 {dimension_numbers = #tpu.dot_dimension_numbers<[1], [0], [0], [1], [0, 0, 1, 1], [], []>} : vector<2x32xf32>, vector<32x128xf32>, vector<2x128xf32> -> vector<2x128xf32>
    %357 = arith.addf %355, %356 : vector<2x128xf32>
    %358 = arith.negf %357 : vector<2x128xf32>
    %359 = math.exp %358 : vector<2x128xf32>
    %cst_145 = arith.constant 1.000000e+00 : f32
    %360 = vector.broadcast %cst_145 : f32 to vector<2x128xf32>
    %361 = arith.addf %360, %359 : vector<2x128xf32>
    %362 = arith.divf %360, %361 : vector<2x128xf32>
    %cst_146 = arith.constant 2.000000e+00 : f32
    %363 = vector.broadcast %cst_146 : f32 to vector<2x128xf32>
    %364 = arith.mulf %363, %362 : vector<2x128xf32>
    %cst_147 = arith.constant 1.000000e+00 : f32
    %365 = vector.broadcast %cst_147 : f32 to vector<2x128xf32>
    %366 = arith.subf %364, %365 : vector<2x128xf32>
    %367 = arith.select %2, %366, %362 : vector<2x128xi1>, vector<2x128xf32>
    %368 = vector.extract_strided_slice %367 {offsets = [0, 0], sizes = [2, 32], strides = [1, 1]} : vector<2x128xf32> to vector<2x32xf32>
    %369 = vector.extract_strided_slice %367 {offsets = [0, 32], sizes = [2, 32], strides = [1, 1]} : vector<2x128xf32> to vector<2x32xf32>
    %370 = vector.extract_strided_slice %367 {offsets = [0, 64], sizes = [2, 32], strides = [1, 1]} : vector<2x128xf32> to vector<2x32xf32>
    %371 = vector.extract_strided_slice %367 {offsets = [0, 96], sizes = [2, 32], strides = [1, 1]} : vector<2x128xf32> to vector<2x32xf32>
    %372 = arith.mulf %369, %351 : vector<2x32xf32>
    %373 = arith.mulf %368, %371 : vector<2x32xf32>
    %374 = arith.addf %372, %373 : vector<2x32xf32>
    %375 = math.tanh %374 : vector<2x32xf32>
    %376 = arith.mulf %370, %375 : vector<2x32xf32>
    %c12_148 = arith.constant 12 : index
    %c0_149 = arith.constant 0 : index
    %377 = vector.load %arg9[%c12_148, %c0_149] : memref<16x32xf32, #tpu.memory_space<vmem>>, vector<2x32xf32>
    tpu.vector_store %arg9[%c12_148, %c0_149], %376 {strides = array<i32>} : memref<16x32xf32, #tpu.memory_space<vmem>>, vector<2x32xf32>,
    %c14_150 = arith.constant 14 : index
    %c0_151 = arith.constant 0 : index
    %378 = vector.load %arg12[%c14_150, %c0_151] : memref<16x128xf32, #tpu.memory_space<vmem>>, vector<2x128xf32>
    %cst_152 = arith.constant dense<0.000000e+00> : vector<2x128xf32>
    %379 = tpu.matmul %376, %206, %cst_152 {dimension_numbers = #tpu.dot_dimension_numbers<[1], [0], [0], [1], [0, 0, 1, 1], [], []>} : vector<2x32xf32>, vector<32x128xf32>, vector<2x128xf32> -> vector<2x128xf32>
    %380 = arith.addf %378, %379 : vector<2x128xf32>
    %381 = arith.negf %380 : vector<2x128xf32>
    %382 = math.exp %381 : vector<2x128xf32>
    %cst_153 = arith.constant 1.000000e+00 : f32
    %383 = vector.broadcast %cst_153 : f32 to vector<2x128xf32>
    %384 = arith.addf %383, %382 : vector<2x128xf32>
    %385 = arith.divf %383, %384 : vector<2x128xf32>
    %cst_154 = arith.constant 2.000000e+00 : f32
    %386 = vector.broadcast %cst_154 : f32 to vector<2x128xf32>
    %387 = arith.mulf %386, %385 : vector<2x128xf32>
    %cst_155 = arith.constant 1.000000e+00 : f32
    %388 = vector.broadcast %cst_155 : f32 to vector<2x128xf32>
    %389 = arith.subf %387, %388 : vector<2x128xf32>
    %390 = arith.select %2, %389, %385 : vector<2x128xi1>, vector<2x128xf32>
    %391 = vector.extract_strided_slice %390 {offsets = [0, 0], sizes = [2, 32], strides = [1, 1]} : vector<2x128xf32> to vector<2x32xf32>
    %392 = vector.extract_strided_slice %390 {offsets = [0, 32], sizes = [2, 32], strides = [1, 1]} : vector<2x128xf32> to vector<2x32xf32>
    %393 = vector.extract_strided_slice %390 {offsets = [0, 64], sizes = [2, 32], strides = [1, 1]} : vector<2x128xf32> to vector<2x32xf32>
    %394 = vector.extract_strided_slice %390 {offsets = [0, 96], sizes = [2, 32], strides = [1, 1]} : vector<2x128xf32> to vector<2x32xf32>
    %395 = arith.mulf %392, %374 : vector<2x32xf32>
    %396 = arith.mulf %391, %394 : vector<2x32xf32>
    %397 = arith.addf %395, %396 : vector<2x32xf32>
    %398 = math.tanh %397 : vector<2x32xf32>
    %399 = arith.mulf %393, %398 : vector<2x32xf32>
    %c14_156 = arith.constant 14 : index
    %c0_157 = arith.constant 0 : index
    %400 = vector.load %arg9[%c14_156, %c0_157] : memref<16x32xf32, #tpu.memory_space<vmem>>, vector<2x32xf32>
    tpu.vector_store %arg9[%c14_156, %c0_157], %399 {strides = array<i32>} : memref<16x32xf32, #tpu.memory_space<vmem>>, vector<2x32xf32>,
    %c1_158 = arith.constant 1 : index
    %c0_159 = arith.constant 0 : index
    %c0_160 = arith.constant 0 : index
    %401 = vector.load %arg10[%c1_158, %c0_159, %c0_160] : memref<2x2x32xf32, #tpu.memory_space<vmem>>, vector<1x2x32xf32>
    %402 = vector.shape_cast %401 : vector<1x2x32xf32> to vector<2x32xf32>
    %403 = vector.shape_cast %399 : vector<2x32xf32> to vector<1x2x32xf32>
    tpu.vector_store %arg10[%c1_158, %c0_159, %c0_160], %403 {strides = array<i32>} : memref<2x2x32xf32, #tpu.memory_space<vmem>>, vector<1x2x32xf32>,
    %c1_161 = arith.constant 1 : index
    %c0_162 = arith.constant 0 : index
    %c0_163 = arith.constant 0 : index
    %404 = vector.load %arg11[%c1_161, %c0_162, %c0_163] : memref<2x2x32xf32, #tpu.memory_space<vmem>>, vector<1x2x32xf32>
    %405 = vector.shape_cast %404 : vector<1x2x32xf32> to vector<2x32xf32>
    %406 = vector.shape_cast %397 : vector<2x32xf32> to vector<1x2x32xf32>
    tpu.vector_store %arg11[%c1_161, %c0_162, %c0_163], %406 {strides = array<i32>} : memref<2x2x32xf32, #tpu.memory_space<vmem>>, vector<1x2x32xf32>,
    return
  }
}

</mosaic_0001>

<bundles_post_ra>
// kernel: tpu_custom_call.1
= control target key start
LH: loop header
LB: loop body
LE: loop exit
PB: predicated region body
PF: predicated region fallthrough
CT: control target
= control target key end

     0   :  { %17 = vsyncpa [#allocation4], 0  ;;  %s3308_s0 = inlined_call_operand.hbm [shape: f32[16,16], index: 0, kind: input, shape index: {}]   ;;  %s3309_s1 = inlined_call_operand.hbm [shape: f32[16,128], index: 1, kind: input, shape index: {}]   ;;  %s3310_s2 = inlined_call_operand.hbm [shape: f32[32,128], index: 2, kind: input, shape index: {}]   ;;  %s3311_s3 = inlined_call_operand.vmem [shape: f32[1,128], index: 3, kind: input, shape index: {}]   ;;  %s3312_s4 = inlined_call_operand.hbm [shape: f32[32,128], index: 4, kind: input, shape index: {}]   ;;  %s3313_s5 = inlined_call_operand.hbm [shape: f32[32,128], index: 5, kind: input, shape index: {}]   ;;  %s3314_s6 = inlined_call_operand.vmem [shape: f32[1,128], index: 6, kind: input, shape index: {}]   ;;  %s3315_s7 = inlined_call_operand.vmem [shape: f32[2,2,32], index: 7, kind: input, shape index: {}]   ;;  %s3316_s8 = inlined_call_operand.vmem [shape: f32[2,2,32], index: 8, kind: input, shape index: {}]   ;;  %s3317_s9 = inlined_call_operand.hbm [shape: f32[16,32], index: 9, kind: output, shape index: {0}]   ;;  %s3318_s10 = inlined_call_operand.hbm [shape: f32[2,2,32], index: 10, kind: output, shape index: {1}]   ;;  %s3319_s11 = inlined_call_operand.hbm [shape: f32[2,2,32], index: 11, kind: output, shape index: {2}]  }
   0x1   :  { %18 = vsyncpa [#allocation7], 0 }
   0x2   :  { %19 = vsyncpa [#allocation10], 0 }
   0x3   :  { %20 = vsyncpa [#allocation5], 0 }
   0x4   :  { %21 = vsyncpa [#allocation14], 0  ;;  %s2816_s17 = smov [#allocation6]   ;;  %s2817_s19 = smov [#allocation9]  }
   0x5   :  { %s39_s18 = sshll.u32 %s2816_s17, 4  ;;  %s65_s20 = sshll.u32 %s2817_s19, 4  ;;  %s40_s18 = int_to_ptr.vmem [resolvable:$true] %s39_s18  ;;  %s2893_s20 = int_to_ptr.vmem [resolvable:$true] %s65_s20 }
   0x6   :  { %s2630_s23 = scalar_lea.hbm %s3309_s1, 256 }
   0x7   :  { %p2631_p0 = scmp.ne.s32.totalorder %s3309_s1, %s2630_s23  ;;  %p2634_p1 = scmp.lt.u32.totalorder %s2630_s23, %s3309_s1 }
   0x9   :  { %p2636_p2 = pnand %p2634_p1, %p2631_p0 }
   0xb   :  { %2639 = shalt.err (!%p2636_p2)
}
   0xc   :  { %s2640_s28 = scalar_lea.vmem %s40_s18, 256  ;;  %p2645_p4 = scmp.lt.s32.totalorder %s40_s18, %s40_s18 }
   0xd   :  { %p2641_p3 = scmp.ne.s32.totalorder %s40_s18, %s2640_s28  ;;  %p2646_p5 = scmp.lt.s32.totalorder %s2640_s28, %s2640_s28 }
   0xf   :  { %p2647_p6 = por %p2646_p5, %p2645_p4 }
  0x11   :  { %p2648_p7 = pnand %p2647_p6, %p2641_p3 }
  0x13   :  { %2651 = shalt.err (!%p2648_p7)
}
  0x14   :  { %s2818_s29 = smov 128   ;;  %s2819_s30 = smov 8  }
  0x15   :  { %45 = dma.hbm_to_vmem [thread:$0]  %s3309_s1, 256, %s40_s18, [#allocation7], %s2818_s29, %s2818_s29, %s2819_s30  }
  0x16   :  { %s2652_s16 = scalar_lea.hbm %s3312_s4, 512 }
  0x17   :  { %p2653_p8 = scmp.ne.s32.totalorder %s3312_s4, %s2652_s16  ;;  %p2656_p9 = scmp.lt.u32.totalorder %s2652_s16, %s3312_s4 }
  0x19   :  { %p2658_p10 = pnand %p2656_p9, %p2653_p8 }
  0x1b   :  { %2661 = shalt.err (!%p2658_p10)
}
  0x1c   :  { %s2662_s23 = scalar_lea.vmem %s2893_s20, 512  ;;  %p2667_p12 = scmp.lt.s32.totalorder %s2893_s20, %s2893_s20 }
  0x1d   :  { %p2663_p11 = scmp.ne.s32.totalorder %s2893_s20, %s2662_s23  ;;  %p2668_p13 = scmp.lt.s32.totalorder %s2662_s23, %s2662_s23 }
  0x1f   :  { %p2669_p0 = por %p2668_p13, %p2667_p12 }
  0x21   :  { %p2670_p1 = pnand %p2669_p0, %p2663_p11 }
  0x23   :  { %2673 = shalt.err (!%p2670_p1)
}
  0x24   :  { %71 = dma.hbm_to_vmem [thread:$0]  %s3312_s4, 512, %s2893_s20, [#allocation10], %s2818_s29, %s2818_s29, %s2819_s30  }
  0x25   :  { %s2820_s24 = smov [#allocation3]   ;;  %s2821_s26 = smov [#allocation8]  }
  0x26   :  { %s27_s25 = sshll.u32 %s2820_s24, 4  ;;  %s51_s27 = sshll.u32 %s2821_s26, 4  ;;  %s28_s25 = int_to_ptr.vmem [resolvable:$true] %s27_s25  ;;  %s2930_s27 = int_to_ptr.vmem [resolvable:$true] %s51_s27 }
  0x27   :  { %s2674_s13 = scalar_lea.hbm %s3308_s0, 256 }
  0x28   :  { %p2675_p2 = scmp.ne.s32.totalorder %s3308_s0, %s2674_s13  ;;  %p2678_p3 = scmp.lt.u32.totalorder %s2674_s13, %s3308_s0 }
  0x2a   :  { %p2680_p4 = pnand %p2678_p3, %p2675_p2 }
  0x2c   :  { %2683 = shalt.err (!%p2680_p4)
}
  0x2d   :  { %s2684_s4 = scalar_lea.vmem %s28_s25, 256  ;;  %p2689_p6 = scmp.lt.s32.totalorder %s28_s25, %s28_s25 }
  0x2e   :  { %p2685_p5 = scmp.ne.s32.totalorder %s28_s25, %s2684_s4  ;;  %p2690_p7 = scmp.lt.s32.totalorder %s2684_s4, %s2684_s4 }
  0x30   :  { %p2691_p8 = por %p2690_p7, %p2689_p6 }
  0x32   :  { %p2692_p9 = pnand %p2691_p8, %p2685_p5 }
  0x34   :  { %2695 = shalt.err (!%p2692_p9)
}
  0x35   :  { %33 = dma.hbm_to_vmem [thread:$0]  %s3308_s0, 256, %s28_s25, [#allocation4], %s2818_s29, %s2818_s29, %s2819_s30  }
  0x36   :  { %s2696_s23 = scalar_lea.hbm %s3310_s2, 512 }
  0x37   :  { %p2697_p10 = scmp.ne.s32.totalorder %s3310_s2, %s2696_s23  ;;  %p2700_p11 = scmp.lt.u32.totalorder %s2696_s23, %s3310_s2 }
  0x39   :  { %p2702_p12 = pnand %p2700_p11, %p2697_p10 }
  0x3b   :  { %2705 = shalt.err (!%p2702_p12)
}
  0x3c   :  { %s2706_s28 = scalar_lea.vmem %s2930_s27, 512  ;;  %p2711_p0 = scmp.lt.s32.totalorder %s2930_s27, %s2930_s27 }
  0x3d   :  { %p2707_p13 = scmp.ne.s32.totalorder %s2930_s27, %s2706_s28  ;;  %p2712_p1 = scmp.lt.s32.totalorder %s2706_s28, %s2706_s28 }
  0x3f   :  { %p2713_p2 = por %p2712_p1, %p2711_p0 }
  0x41   :  { %p2714_p3 = pnand %p2713_p2, %p2707_p13 }
  0x43   :  { %2717 = shalt.err (!%p2714_p3)
}
  0x44   :  { %57 = dma.hbm_to_vmem [thread:$0]  %s3310_s2, 512, %s2930_s27, [#allocation7], %s2818_s29, %s2818_s29, %s2819_s30  }
  0x45   :  { %s2822_s12 = smov [#allocation11]   ;;  %s2718_s16 = scalar_lea.hbm %s3313_s5, 512 }
  0x46   :  { %s77_s13 = sshll.u32 %s2822_s12, 4  ;;  %p2719_p4 = scmp.ne.s32.totalorder %s3313_s5, %s2718_s16  ;;  %s78_s13 = int_to_ptr.vmem [resolvable:$true] %s77_s13 }
  0x47   :  { %p2722_p5 = scmp.lt.u32.totalorder %s2718_s16, %s3313_s5 }
  0x49   :  { %p2724_p6 = pnand %p2722_p5, %p2719_p4 }
  0x4b   :  { %2727 = shalt.err (!%p2724_p6)
}
  0x4c   :  { %s2728_s21 = scalar_lea.vmem %s78_s13, 512  ;;  %p2733_p8 = scmp.lt.s32.totalorder %s78_s13, %s78_s13 }
  0x4d   :  { %p2729_p7 = scmp.ne.s32.totalorder %s78_s13, %s2728_s21  ;;  %p2734_p9 = scmp.lt.s32.totalorder %s2728_s21, %s2728_s21 }
  0x4f   :  { %p2735_p10 = por %p2734_p9, %p2733_p8 }
  0x51   :  { %p2736_p11 = pnand %p2735_p10, %p2729_p7 }
  0x53   :  { %2739 = shalt.err (!%p2736_p11)
}
  0x54   :  { %83 = dma.hbm_to_vmem [thread:$0]  %s3313_s5, 512, %s78_s13, [#allocation10], %s2818_s29, %s2818_s29, %s2819_s30  }
  0x55   :  { %2806 = dma.done.wait [#allocation4], 256  }
  0x56   :  { %2807 = vsyncadd [#allocation4], 4294967040 }
  0x57   :  { %2808 = dma.done.wait [#allocation7], 768  }
  0x58   :  { %2809 = vsyncadd [#allocation7], 4294966528 }
  0x59   :  { %2810 = dma.done.wait [#allocation10], 1024  }
  0x5a   :  { %2811 = vsyncadd [#allocation10], 4294966272  ;;  %v2823_v0 = vmov 0.0|0.0   ;;  %vm2824_vm0 = vmmov 0   ;;  %v2825_v1 = vmov 0.0   ;;  %vm123_vm1 = vcmask 130048  }
  0x5b   :  { %2413 = vmatprep.subr.bf16.mxu1 %v2823_v0  ;;  %2230 = vmatprep.mubr.msk.f32.mxu1 %vm2824_vm0, %v2825_v1  ;;  %v108_v2 = vld [vmem:[#allocation6] sm:$0xff]  ;;  %v109_v3 = vld [vmem:[#allocation6 + $0x8] sm:$0xff]  ;;  %v115_v4 = vld [vmem:[#allocation3] sm:$0xff]  ;;  %vm210_vm2 = vcmask 261120   ;;  %v105_v26 = vlaneseq  ;;  %s2827_s26 = smov 64   ;;  %vm319_vm4 = vcmask 254976  }
  0x5c   :  { %v2409_v5 = vpack.c.bf16 %v109_v3, %v108_v2  ;;  %2219 = vmatprep.mubr.msk.f32.mxu0 %vm123_vm1, %v115_v4  ;;  %v110_v6 = vld [vmem:[#allocation8] sm:$0xff]  ;;  %v111_v7 = vld [vmem:[#allocation8 + $0x8] sm:$0xff]  ;;  %v112_v9 = vld [vmem:[#allocation8 + $0x10] sm:$0xff]  ;;  %s2829_s13 = smov [#allocation13]   ;;  %s2830_s15 = smov [#allocation12]  }
  0x5d   :  { %v2986_v8 = vpack.c.bf16 %v111_v7, %v110_v6  ;;  %v113_v10 = vld [vmem:[#allocation8 + $0x18] sm:$0xff]  ;;  %v116_v11 = vld [vmem:[#allocation3 + $0x8] sm:$0xff]  ;;  %v207_v13 = vld [vmem:[%s3315_s7] sm:$0x3]  ;;  %v3015_v27 = vand.u32 127, %v105_v26  ;;  %s2036_s14 = sshll.u32 %s2829_s13, 4  ;;  %s2037_s14 = int_to_ptr.vmem [resolvable:$true] %s2036_s14 }
  0x5e   :  { %2410 = vmatprep.subr.bf16.mxu0 %v2409_v5  ;;  %v2989_v12 = vpack.c.bf16 %v113_v10, %v112_v9  ;;  %v2069_v14 = vld [vmem:[%s3311_s3] ss:$0 sm:$0xff]  ;;  %s2826_s3 = smov 32   ;;  %s2024_s16 = sshll.u32 %s2830_s15, 4  ;;  %s3246_s16 = int_to_ptr.vmem [resolvable:$true] %s2024_s16 }
  0x5f   :  { %2412 = vmatpush3.bf16.msra.mxu0 %v2409_v5  ;;  %2415 = vmatpush3.bf16.msra.mxu1 %v2986_v8  ;;  %vm107_vm3 = vcmp.ge.s32.totalorder %v3015_v27, 96  ;;  %v208_v32 = vld [vmem:[%s3316_s8] sm:$0x3]  ;;  %s2831_s17 = smov [#allocation15]   ;;  %s2740_s20 = scalar_lea.vmem %s2037_s14, 64 }
  0x60   :  { %2416 = vmatprep.subr.bf16.mxu1 %v2823_v0  ;;  %2419 = vmatprep.subr.bf16.mxu0 %v2823_v0  ;;  %s2048_s4 = sshll.u32 %s2831_s17, 4  ;;  %p2741_p12 = scmp.ne.s32.totalorder %s2037_s14, %s2740_s20  ;;  %s3250_s4 = int_to_ptr.vmem [resolvable:$true] %s2048_s4 }
  0x61   :  { %p2745_p13 = scmp.lt.s32.totalorder %s2037_s14, %s2037_s14  ;;  %p2746_p0 = scmp.lt.s32.totalorder %s2740_s20, %s2740_s20 }
  0x62   :  { %2220 = vmatmul.mubr.msk.f32.vlgmr.msra.gmra.mrb[0].mxu0 %vm123_vm1, %v116_v11 }
  0x63   :  { %2418 = vmatpush3.bf16.msra.mxu1 %v2989_v12  ;;  %2421 = vmatpush3.bf16.msra.mxu0 %v2986_v8  ;;  %p2747_p1 = por %p2746_p0, %p2745_p13 }
  0x64   :  { %2422 = vmatprep.subr.bf16.mxu0 %v2823_v0  ;;  %2241 = vmatprep.mubr.msk.f32.mxu0 %vm2824_vm0, %v2825_v1 }
  0x65   :  { %2425 = vmatprep.subr.bf16.mxu1 %v2823_v0  ;;  %p2748_p2 = pnand %p2747_p1, %p2741_p12 }
  0x66   :  { %2231 = vmatmul.mubr.msk.f32.vlgmr.msra.gmra.mrb[0].mxu1 %vm210_vm2, %v207_v13 }
  0x67   :  { %2424 = vmatpush3.bf16.msra.mxu0 %v2989_v12  ;;  %2427 = vmatpush3.bf16.msra.mxu1 %v2986_v8 }
  0x68   :  { %2428 = vmatprep.subr.bf16.mxu1 %v2823_v0  ;;  %2252 = vmatprep.mubr.msk.f32.mxu1 %vm2824_vm0, %v2825_v1 }
  0x69   :  { %2431 = vmatprep.subr.bf16.mxu0 %v2823_v0 }
  0x6b   :  { %2430 = vmatpush3.bf16.msra.mxu1 %v2989_v12 }
  0x6c   :  { %2437 = vmatprep.subr.bf16.mxu1 %v2823_v0 }
 0x135   :  { %v2221_v15 = vpop.f32.mrb[0].mxu0 }
 0x136   :  { %v202_v16 = vadd.f32 %v2221_v15, %v2069_v14  ;;  %v196_v17 = vpop.f32.mrb[1].mxu0 }
 0x137   :  { %v197_v18 = vadd.f32 %v2069_v14, %v196_v17 }
 0x138   :  { %206 = vst [vmem:[#allocation2 + $0x8] sm:$0xff] %v202_v16 }
 0x139   :  { %205 = vst [vmem:[#allocation2] sm:$0xff] %v197_v18  ;;  %v280_v19 = vpop.f32.mrb[0].mxu1 }
 0x13a   :  { %v2232_v20 = vpop.f32.mrb[1].mxu1 }
 0x140   :  { %v209_v21 = vld [vmem:[#allocation2] sm:$0x3]  ;;  %v321_v43 = vld [vmem:[#allocation2 + $0x2] sm:$0x3]  ;;  %v426_v63 = vld [vmem:[#allocation2 + $0x4] sm:$0x3] }
 0x141   :  { %v284_v22 = vadd.f32 %v280_v19, %v209_v21 }
 0x143   :  { %v2073_v23 = vmul.f32 -1.442695, %v284_v22 }
 0x145   :  { %2534 = vpow2.f32 %v2073_v23  ;;  %v531_v23 = vld [vmem:[#allocation2 + $0x6] sm:$0x3] }
 0x14f   :  { %v2535_v24 = vpop.eup %2534 }
 0x150   :  { %v288_v25 = vadd.f32 1.0, %v2535_v24 }
 0x152   :  { %2536 = vrcp.f32 %v288_v25 }
 0x15c   :  { %v2537_v28 = vpop.eup %2536 }
 0x15d   :  { %v291_v29 = vmul.f32 2.0, %v2537_v28 }
 0x15f   :  { %v2074_v30 = vadd.f32 -1.0, %v291_v29 }
 0x161   :  { %v293_v31 = vsel %vm107_vm3, %v2074_v30, %v2537_v28 }
 0x162   :  { %300 = vrot.lane.b32.xlu0 %v293_v31, %s2826_s3 }
 0x166   :  { %295 = vrot.lane.b32.xlu0 %v208_v32, %s2826_s3 }
 0x1d4   :  { %v301_v33 = vpop.permute.xlu0 %300 }
 0x1d5   :  { %v303_v34 = vmul.f32 %v301_v33, %v293_v31 }
 0x1d7   :  { %305 = vrot.lane.b32.xlu1 %v303_v34, %s2826_s3 }
 0x1d8   :  { %v296_v35 = vpop.permute.xlu0 %295 }
 0x1d9   :  { %v298_v36 = vmul.f32 %v296_v35, %v293_v31 }
 0x249   :  { %v306_v37 = vpop.permute.xlu1 %305 }
 0x24a   :  { %v308_v38 = vadd.f32 %v306_v37, %v298_v36 }
 0x24c   :  { %2538 = vtanh.f32 %v308_v38 }
 0x256   :  { %v2539_v39 = vpop.eup %2538 }
 0x257   :  { %311 = vrot.lane.b32.xlu1 %v2539_v39, %s2826_s3 }
 0x2c9   :  { %v312_v40 = vpop.permute.xlu1 %311 }
 0x2ca   :  { %v314_v41 = vmul.f32 %v312_v40, %v293_v31 }
 0x2cc   :  { %316 = vrot.lane.b32.xlu0 %v314_v41, %s2827_s26 }
 0x33e   :  { %v317_v42 = vpop.permute.xlu0 %316 }
 0x33f   :  { %320 = vst.msk [vmem:[#allocation12] sm:$0x3] %vm319_vm4, %v317_v42  ;;  %2242 = vmatmul.mubr.msk.f32.vlgmr.msra.gmra.mrb[2].mxu0 %vm210_vm2, %v317_v42 }
 0x340   :  { %2433 = vmatpush3.bf16.msra.mxu0 %v2986_v8  ;;  %2263 = vmatprep.mubr.msk.f32.mxu0 %vm2824_vm0, %v2825_v1 }
 0x341   :  { %2434 = vmatprep.subr.bf16.mxu0 %v2823_v0 }
 0x344   :  { %2436 = vmatpush3.bf16.msra.mxu0 %v2989_v12 }
 0x345   :  { %2443 = vmatprep.subr.bf16.mxu0 %v2823_v0 }
 0x412   :  { %v390_v44 = vpop.f32.mrb[2].mxu0 }
 0x413   :  { %v394_v45 = vadd.f32 %v390_v44, %v321_v43  ;;  %v2243_v46 = vpop.f32.mrb[3].mxu0  ;;  %v636_v44 = vld [vmem:[#allocation2 + $0x8] sm:$0x3] }
 0x415   :  { %v2076_v47 = vmul.f32 -1.442695, %v394_v45 }
 0x417   :  { %2540 = vpow2.f32 %v2076_v47 }
 0x421   :  { %v2541_v48 = vpop.eup %2540 }
 0x422   :  { %v398_v49 = vadd.f32 1.0, %v2541_v48 }
 0x424   :  { %2542 = vrcp.f32 %v398_v49 }
 0x42e   :  { %v2543_v50 = vpop.eup %2542 }
 0x42f   :  { %v401_v51 = vmul.f32 2.0, %v2543_v50 }
 0x431   :  { %v2077_v52 = vadd.f32 -1.0, %v401_v51 }
 0x433   :  { %v403_v53 = vsel %vm107_vm3, %v2077_v52, %v2543_v50 }
 0x434   :  { %406 = vrot.lane.b32.xlu1 %v403_v53, %s2826_s3  ;;  %v404_v56 = vmul.f32 %v403_v53, %v308_v38 }
 0x4a6   :  { %v407_v54 = vpop.permute.xlu1 %406 }
 0x4a7   :  { %v409_v55 = vmul.f32 %v407_v54, %v403_v53 }
 0x4a9   :  { %411 = vrot.lane.b32.xlu0 %v409_v55, %s2826_s3 }
 0x51b   :  { %v412_v57 = vpop.permute.xlu0 %411 }
 0x51c   :  { %v414_v58 = vadd.f32 %v412_v57, %v404_v56 }
 0x51e   :  { %2544 = vtanh.f32 %v414_v58 }
 0x528   :  { %v2545_v59 = vpop.eup %2544 }
 0x529   :  { %417 = vrot.lane.b32.xlu1 %v2545_v59, %s2826_s3 }
 0x59b   :  { %v418_v60 = vpop.permute.xlu1 %417 }
 0x59c   :  { %v420_v61 = vmul.f32 %v418_v60, %v403_v53 }
 0x59e   :  { %422 = vrot.lane.b32.xlu0 %v420_v61, %s2827_s26 }
 0x610   :  { %v423_v62 = vpop.permute.xlu0 %422 }
 0x611   :  { %425 = vst.msk [vmem:[#allocation12 + $0x2] sm:$0x3] %vm319_vm4, %v423_v62  ;;  %2253 = vmatmul.mubr.msk.f32.vlgmr.msra.gmra.mrb[2].mxu1 %vm210_vm2, %v423_v62 }
 0x612   :  { %2439 = vmatpush3.bf16.msra.mxu1 %v2986_v8  ;;  %2274 = vmatprep.mubr.msk.f32.mxu1 %vm2824_vm0, %v2825_v1 }
 0x613   :  { %2440 = vmatprep.subr.bf16.mxu1 %v2823_v0 }
 0x616   :  { %2442 = vmatpush3.bf16.msra.mxu1 %v2989_v12 }
 0x617   :  { %2449 = vmatprep.subr.bf16.mxu1 %v2823_v0 }
 0x6e4   :  { %v495_v2 = vpop.f32.mrb[2].mxu1 }
 0x6e5   :  { %v499_v3 = vadd.f32 %v495_v2, %v426_v63  ;;  %v2254_v4 = vpop.f32.mrb[3].mxu1  ;;  %v741_v2 = vld [vmem:[#allocation2 + $0xa] sm:$0x3] }
 0x6e7   :  { %v2079_v5 = vmul.f32 -1.442695, %v499_v3 }
 0x6e9   :  { %2546 = vpow2.f32 %v2079_v5 }
 0x6f3   :  { %v2547_v6 = vpop.eup %2546 }
 0x6f4   :  { %v503_v7 = vadd.f32 1.0, %v2547_v6 }
 0x6f6   :  { %2548 = vrcp.f32 %v503_v7 }
 0x700   :  { %v2549_v9 = vpop.eup %2548 }
 0x701   :  { %v506_v10 = vmul.f32 2.0, %v2549_v9 }
 0x703   :  { %v2080_v11 = vadd.f32 -1.0, %v506_v10 }
 0x705   :  { %v508_v13 = vsel %vm107_vm3, %v2080_v11, %v2549_v9 }
 0x706   :  { %511 = vrot.lane.b32.xlu1 %v508_v13, %s2826_s3  ;;  %v509_v16 = vmul.f32 %v508_v13, %v414_v58 }
 0x778   :  { %v512_v14 = vpop.permute.xlu1 %511 }
 0x779   :  { %v514_v15 = vmul.f32 %v512_v14, %v508_v13 }
 0x77b   :  { %516 = vrot.lane.b32.xlu0 %v514_v15, %s2826_s3 }
 0x7ed   :  { %v517_v17 = vpop.permute.xlu0 %516 }
 0x7ee   :  { %v519_v18 = vadd.f32 %v517_v17, %v509_v16 }
 0x7f0   :  { %2550 = vtanh.f32 %v519_v18 }
 0x7fa   :  { %v2551_v19 = vpop.eup %2550 }
 0x7fb   :  { %522 = vrot.lane.b32.xlu1 %v2551_v19, %s2826_s3 }
 0x86d   :  { %v523_v20 = vpop.permute.xlu1 %522 }
 0x86e   :  { %v525_v21 = vmul.f32 %v523_v20, %v508_v13 }
 0x870   :  { %527 = vrot.lane.b32.xlu0 %v525_v21, %s2827_s26 }
 0x8e2   :  { %v528_v22 = vpop.permute.xlu0 %527 }
 0x8e3   :  { %530 = vst.msk [vmem:[#allocation12 + $0x4] sm:$0x3] %vm319_vm4, %v528_v22  ;;  %2264 = vmatmul.mubr.msk.f32.vlgmr.msra.gmra.mrb[4].mxu0 %vm210_vm2, %v528_v22 }
 0x8e4   :  { %2445 = vmatpush3.bf16.msra.mxu0 %v2986_v8  ;;  %2285 = vmatprep.mubr.msk.f32.mxu0 %vm2824_vm0, %v2825_v1 }
 0x8e5   :  { %2446 = vmatprep.subr.bf16.mxu0 %v2823_v0 }
 0x8e8   :  { %2448 = vmatpush3.bf16.msra.mxu0 %v2989_v12 }
 0x8e9   :  { %2455 = vmatprep.subr.bf16.mxu0 %v2823_v0 }
 0x9b6   :  { %v600_v24 = vpop.f32.mrb[4].mxu0 }
 0x9b7   :  { %v604_v25 = vadd.f32 %v600_v24, %v531_v23  ;;  %v2265_v26 = vpop.f32.mrb[5].mxu0  ;;  %v846_v23 = vld [vmem:[#allocation2 + $0xc] sm:$0x3] }
 0x9b9   :  { %v2082_v28 = vmul.f32 -1.442695, %v604_v25 }
 0x9bb   :  { %2552 = vpow2.f32 %v2082_v28 }
 0x9c5   :  { %v2553_v29 = vpop.eup %2552 }
 0x9c6   :  { %v608_v30 = vadd.f32 1.0, %v2553_v29 }
 0x9c8   :  { %2554 = vrcp.f32 %v608_v30 }
 0x9d2   :  { %v2555_v31 = vpop.eup %2554 }
 0x9d3   :  { %v611_v32 = vmul.f32 2.0, %v2555_v31 }
 0x9d5   :  { %v2083_v33 = vadd.f32 -1.0, %v611_v32 }
 0x9d7   :  { %v613_v34 = vsel %vm107_vm3, %v2083_v33, %v2555_v31 }
 0x9d8   :  { %616 = vrot.lane.b32.xlu1 %v613_v34, %s2826_s3  ;;  %v614_v37 = vmul.f32 %v613_v34, %v519_v18 }
 0xa4a   :  { %v617_v35 = vpop.permute.xlu1 %616 }
 0xa4b   :  { %v619_v36 = vmul.f32 %v617_v35, %v613_v34 }
 0xa4d   :  { %621 = vrot.lane.b32.xlu0 %v619_v36, %s2826_s3 }
 0xabf   :  { %v622_v38 = vpop.permute.xlu0 %621 }
 0xac0   :  { %v624_v39 = vadd.f32 %v622_v38, %v614_v37 }
 0xac2   :  { %2556 = vtanh.f32 %v624_v39 }
 0xacc   :  { %v2557_v40 = vpop.eup %2556 }
 0xacd   :  { %627 = vrot.lane.b32.xlu1 %v2557_v40, %s2826_s3 }
 0xb3f   :  { %v628_v41 = vpop.permute.xlu1 %627 }
 0xb40   :  { %v630_v42 = vmul.f32 %v628_v41, %v613_v34 }
 0xb42   :  { %632 = vrot.lane.b32.xlu0 %v630_v42, %s2827_s26 }
 0xbb4   :  { %v633_v43 = vpop.permute.xlu0 %632 }
 0xbb5   :  { %635 = vst.msk [vmem:[#allocation12 + $0x6] sm:$0x3] %vm319_vm4, %v633_v43  ;;  %2275 = vmatmul.mubr.msk.f32.vlgmr.msra.gmra.mrb[4].mxu1 %vm210_vm2, %v633_v43 }
 0xbb6   :  { %2451 = vmatpush3.bf16.msra.mxu1 %v2986_v8  ;;  %2296 = vmatprep.mubr.msk.f32.mxu1 %vm2824_vm0, %v2825_v1 }
 0xbb7   :  { %2452 = vmatprep.subr.bf16.mxu1 %v2823_v0 }
 0xbba   :  { %2454 = vmatpush3.bf16.msra.mxu1 %v2989_v12 }
 0xbbc   :  { %v1071_v22 = vld [vmem:[#allocation12] sm:$0xff] }
 0xc88   :  { %v705_v45 = vpop.f32.mrb[4].mxu1 }
 0xc89   :  { %v709_v46 = vadd.f32 %v705_v45, %v636_v44  ;;  %v2276_v47 = vpop.f32.mrb[5].mxu1  ;;  %v951_v44 = vld [vmem:[#allocation2 + $0xe] sm:$0x3] }
 0xc8b   :  { %v2085_v48 = vmul.f32 -1.442695, %v709_v46 }
 0xc8d   :  { %2558 = vpow2.f32 %v2085_v48 }
 0xc97   :  { %v2559_v49 = vpop.eup %2558 }
 0xc98   :  { %v713_v50 = vadd.f32 1.0, %v2559_v49 }
 0xc9a   :  { %2560 = vrcp.f32 %v713_v50 }
 0xca4   :  { %v2561_v51 = vpop.eup %2560 }
 0xca5   :  { %v716_v52 = vmul.f32 2.0, %v2561_v51 }
 0xca7   :  { %v2086_v53 = vadd.f32 -1.0, %v716_v52 }
 0xca9   :  { %v718_v54 = vsel %vm107_vm3, %v2086_v53, %v2561_v51 }
 0xcaa   :  { %721 = vrot.lane.b32.xlu1 %v718_v54, %s2826_s3  ;;  %v719_v57 = vmul.f32 %v718_v54, %v624_v39 }
 0xd1c   :  { %v722_v55 = vpop.permute.xlu1 %721 }
 0xd1d   :  { %v724_v56 = vmul.f32 %v722_v55, %v718_v54 }
 0xd1f   :  { %726 = vrot.lane.b32.xlu0 %v724_v56, %s2826_s3 }
 0xd91   :  { %v727_v58 = vpop.permute.xlu0 %726 }
 0xd92   :  { %v729_v59 = vadd.f32 %v727_v58, %v719_v57 }
 0xd94   :  { %2562 = vtanh.f32 %v729_v59 }
 0xd9e   :  { %v2563_v60 = vpop.eup %2562 }
 0xd9f   :  { %732 = vrot.lane.b32.xlu1 %v2563_v60, %s2826_s3 }
 0xe11   :  { %v733_v61 = vpop.permute.xlu1 %732 }
 0xe12   :  { %v735_v62 = vmul.f32 %v733_v61, %v718_v54  ;;  %v1062_v61 = vld [vmem:[#allocation9] sm:$0xff] }
 0xe14   :  { %737 = vrot.lane.b32.xlu0 %v735_v62, %s2827_s26  ;;  %v1063_v62 = vld [vmem:[#allocation9 + $0x8] sm:$0xff] }
 0xe86   :  { %v738_v63 = vpop.permute.xlu0 %737 }
 0xe87   :  { %740 = vst.msk [vmem:[#allocation12 + $0x8] sm:$0x3] %vm319_vm4, %v738_v63  ;;  %2286 = vmatmul.mubr.msk.f32.vlgmr.msra.gmra.mrb[6].mxu0 %vm210_vm2, %v738_v63  ;;  %v2461_v63 = vpack.c.bf16 %v1063_v62, %v1062_v61 }
 0xe88   :  { %2457 = vmatpush3.bf16.msra.mxu0 %v2986_v8  ;;  %2307 = vmatprep.mubr.msk.f32.mxu0 %vm2824_vm0, %v2825_v1 }
 0xe89   :  { %2458 = vmatprep.subr.bf16.mxu0 %v2823_v0  ;;  %2462 = vmatprep.subr.bf16.mxu1 %v2461_v63 }
 0xe8c   :  { %2460 = vmatpush3.bf16.msra.mxu0 %v2989_v12 }
 0xe8d   :  { %2469 = vmatprep.subr.bf16.mxu0 %v2823_v0 }
 0xf5a   :  { %v810_v3 = vpop.f32.mrb[6].mxu0 }
 0xf5b   :  { %v814_v4 = vadd.f32 %v810_v3, %v741_v2  ;;  %v2287_v5 = vpop.f32.mrb[7].mxu0  ;;  %v1064_v2 = vld [vmem:[#allocation9 + $0x10] sm:$0xff]  ;;  %v1065_v3 = vld [vmem:[#allocation9 + $0x18] sm:$0xff] }
 0xf5c   :  { %v1066_v5 = vld [vmem:[#allocation11] sm:$0xff] }
 0xf5d   :  { %v2088_v6 = vmul.f32 -1.442695, %v814_v4  ;;  %v2465_v4 = vpack.c.bf16 %v1065_v3, %v1064_v2 }
 0xf5f   :  { %2564 = vpow2.f32 %v2088_v6  ;;  %v1067_v6 = vld [vmem:[#allocation11 + $0x8] sm:$0xff] }
 0xf69   :  { %v2565_v7 = vpop.eup %2564 }
 0xf6a   :  { %v818_v9 = vadd.f32 1.0, %v2565_v7  ;;  %v1068_v7 = vld [vmem:[#allocation11 + $0x10] sm:$0xff] }
 0xf6c   :  { %2566 = vrcp.f32 %v818_v9  ;;  %v3119_v9 = vpack.c.bf16 %v1067_v6, %v1066_v5 }
 0xf76   :  { %v2567_v10 = vpop.eup %2566 }
 0xf77   :  { %v821_v8 = vmul.f32 2.0, %v2567_v10 }
 0xf79   :  { %v2089_v11 = vadd.f32 -1.0, %v821_v8 }
 0xf7b   :  { %v823_v13 = vsel %vm107_vm3, %v2089_v11, %v2567_v10  ;;  %v1069_v10 = vld [vmem:[#allocation11 + $0x18] sm:$0xff] }
 0xf7c   :  { %826 = vrot.lane.b32.xlu1 %v823_v13, %s2826_s3  ;;  %v824_v15 = vmul.f32 %v823_v13, %v729_v59 }
 0xfee   :  { %v827_v12 = vpop.permute.xlu1 %826 }
 0xfef   :  { %v829_v14 = vmul.f32 %v827_v12, %v823_v13  ;;  %v2100_v12 = vld [vmem:[%s3316_s8 + $0x2] sm:$0x3] }
 0xff1   :  { %831 = vrot.lane.b32.xlu0 %v829_v14, %s2826_s3  ;;  %v2099_v14 = vld [vmem:[%s3315_s7 + $0x2] sm:$0x3] }
0x1063   :  { %v832_v16 = vpop.permute.xlu0 %831 }
0x1064   :  { %v834_v17 = vadd.f32 %v832_v16, %v824_v15 }
0x1066   :  { %2568 = vtanh.f32 %v834_v17 }
0x1070   :  { %v2569_v18 = vpop.eup %2568 }
0x1071   :  { %837 = vrot.lane.b32.xlu1 %v2569_v18, %s2826_s3 }
0x10e3   :  { %v838_v19 = vpop.permute.xlu1 %837 }
0x10e4   :  { %v840_v20 = vmul.f32 %v838_v19, %v823_v13  ;;  %v3122_v13 = vpack.c.bf16 %v1069_v10, %v1068_v7  ;;  %v2096_v19 = vld [vmem:[%s3314_s6] ss:$0 sm:$0xff]  ;;  %s2828_s6 = smov 96  }
0x10e6   :  { %842 = vrot.lane.b32.xlu0 %v840_v20, %s2827_s26 }
0x1158   :  { %v843_v21 = vpop.permute.xlu0 %842 }
0x1159   :  { %845 = vst.msk [vmem:[#allocation12 + $0xa] sm:$0x3] %vm319_vm4, %v843_v21  ;;  %2297 = vmatmul.mubr.msk.f32.vlgmr.msra.gmra.mrb[6].mxu1 %vm210_vm2, %v843_v21 }
0x115a   :  { %2318 = vmatprep.mubr.msk.f32.mxu1 %vm210_vm2, %v1071_v22  ;;  %2464 = vmatpush3.bf16.msra.mxu1 %v2461_v63 }
0x115b   :  { %2466 = vmatprep.subr.bf16.mxu1 %v2465_v4 }
0x115e   :  { %2468 = vmatpush3.bf16.msra.mxu1 %v2465_v4 }
0x115f   :  { %2475 = vmatprep.subr.bf16.mxu1 %v2823_v0 }
0x122c   :  { %v915_v24 = vpop.f32.mrb[6].mxu1 }
0x122d   :  { %v919_v25 = vadd.f32 %v915_v24, %v846_v23  ;;  %v2298_v26 = vpop.f32.mrb[7].mxu1 }
0x122f   :  { %v2091_v28 = vmul.f32 -1.442695, %v919_v25 }
0x1231   :  { %2570 = vpow2.f32 %v2091_v28 }
0x123b   :  { %v2571_v29 = vpop.eup %2570 }
0x123c   :  { %v923_v30 = vadd.f32 1.0, %v2571_v29 }
0x123e   :  { %2572 = vrcp.f32 %v923_v30 }
0x1248   :  { %v2573_v31 = vpop.eup %2572 }
0x1249   :  { %v926_v32 = vmul.f32 2.0, %v2573_v31 }
0x124b   :  { %v2092_v33 = vadd.f32 -1.0, %v926_v32 }
0x124d   :  { %v928_v34 = vsel %vm107_vm3, %v2092_v33, %v2573_v31 }
0x124e   :  { %931 = vrot.lane.b32.xlu1 %v928_v34, %s2826_s3  ;;  %v929_v37 = vmul.f32 %v928_v34, %v834_v17 }
0x12c0   :  { %v932_v35 = vpop.permute.xlu1 %931 }
0x12c1   :  { %v934_v36 = vmul.f32 %v932_v35, %v928_v34 }
0x12c3   :  { %936 = vrot.lane.b32.xlu0 %v934_v36, %s2826_s3 }
0x1335   :  { %v937_v38 = vpop.permute.xlu0 %936 }
0x1336   :  { %v939_v39 = vadd.f32 %v937_v38, %v929_v37 }
0x1338   :  { %2574 = vtanh.f32 %v939_v39 }
0x1342   :  { %v2575_v40 = vpop.eup %2574 }
0x1343   :  { %942 = vrot.lane.b32.xlu1 %v2575_v40, %s2826_s3 }
0x13b5   :  { %v943_v41 = vpop.permute.xlu1 %942 }
0x13b6   :  { %v945_v42 = vmul.f32 %v943_v41, %v928_v34 }
0x13b8   :  { %947 = vrot.lane.b32.xlu0 %v945_v42, %s2827_s26 }
0x142a   :  { %v948_v43 = vpop.permute.xlu0 %947 }
0x142b   :  { %950 = vst.msk [vmem:[#allocation12 + $0xc] sm:$0x3] %vm319_vm4, %v948_v43  ;;  %2308 = vmatmul.mubr.msk.f32.vlgmr.msra.gmra.mrb[8].mxu0 %vm210_vm2, %v948_v43 }
0x142c   :  { %2329 = vmatprep.mubr.msk.f32.mxu0 %vm2824_vm0, %v2825_v1  ;;  %2471 = vmatpush3.bf16.msra.mxu0 %v3119_v9 }
0x142d   :  { %2472 = vmatprep.subr.bf16.mxu0 %v2823_v0 }
0x1430   :  { %2474 = vmatpush3.bf16.msra.mxu0 %v3122_v13 }
0x1431   :  { %2481 = vmatprep.subr.bf16.mxu0 %v2823_v0 }
0x1433   :  { %2330 = vmatmul.mubr.msk.f32.vlgmr.msra.gmra.mrb[10].mxu0 %vm210_vm2, %v2099_v14 }
0x1434   :  { %2483 = vmatpush3.bf16.msra.mxu0 %v3119_v9  ;;  %2351 = vmatprep.mubr.msk.f32.mxu0 %vm2824_vm0, %v2825_v1 }
0x1435   :  { %2484 = vmatprep.subr.bf16.mxu0 %v2823_v0 }
0x1438   :  { %2486 = vmatpush3.bf16.msra.mxu0 %v3122_v13 }
0x1439   :  { %2493 = vmatprep.subr.bf16.mxu0 %v2823_v0 }
0x14fe   :  { %v1020_v45 = vpop.f32.mrb[8].mxu0 }
0x14ff   :  { %v1024_v46 = vadd.f32 %v1020_v45, %v951_v44  ;;  %v2309_v47 = vpop.f32.mrb[9].mxu0 }
0x1501   :  { %v2094_v48 = vmul.f32 -1.442695, %v1024_v46 }
0x1503   :  { %2576 = vpow2.f32 %v2094_v48 }
0x1506   :  { %v1236_v17 = vpop.f32.mrb[10].mxu0 }
0x1507   :  { %v2331_v18 = vpop.f32.mrb[11].mxu0 }
0x150d   :  { %v2577_v49 = vpop.eup %2576 }
0x150e   :  { %v1028_v50 = vadd.f32 1.0, %v2577_v49 }
0x1510   :  { %2578 = vrcp.f32 %v1028_v50 }
0x151a   :  { %v2579_v51 = vpop.eup %2578 }
0x151b   :  { %v1031_v52 = vmul.f32 2.0, %v2579_v51 }
0x151d   :  { %v2095_v53 = vadd.f32 -1.0, %v1031_v52 }
0x151f   :  { %v1033_v54 = vsel %vm107_vm3, %v2095_v53, %v2579_v51 }
0x1520   :  { %1036 = vrot.lane.b32.xlu1 %v1033_v54, %s2826_s3  ;;  %v1034_v57 = vmul.f32 %v1033_v54, %v939_v39 }
0x1592   :  { %v1037_v55 = vpop.permute.xlu1 %1036 }
0x1593   :  { %v1039_v56 = vmul.f32 %v1037_v55, %v1033_v54 }
0x1595   :  { %1041 = vrot.lane.b32.xlu0 %v1039_v56, %s2826_s3 }
0x1607   :  { %v1042_v58 = vpop.permute.xlu0 %1041 }
0x1608   :  { %v3114_v59 = vadd.f32 %v1042_v58, %v1034_v57 }
0x160a   :  { %2580 = vtanh.f32 %v3114_v59 }
0x1614   :  { %v2581_v60 = vpop.eup %2580 }
0x1615   :  { %1047 = vrot.lane.b32.xlu1 %v2581_v60, %s2826_s3 }
0x1687   :  { %v1048_v8 = vpop.permute.xlu1 %1047 }
0x1688   :  { %v1050_v11 = vmul.f32 %v1048_v8, %v1033_v54 }
0x168a   :  { %1052 = vrot.lane.b32.xlu0 %v1050_v11, %s2827_s26 }
0x168e   :  { %1251 = vrot.lane.b32.xlu0 %v2100_v12, %s2826_s3 }
0x16fc   :  { %v1053_v15 = vpop.permute.xlu0 %1052 }
0x16fd   :  { %1055 = vst.msk [vmem:[#allocation12 + $0xe] sm:$0x3] %vm319_vm4, %v1053_v15  ;;  %1056 = vst.msk [vmem:[#allocation13] sm:$0x3] %vm319_vm4, %v1053_v15 }
0x1700   :  { %v1252_v36 = vpop.permute.xlu0 %1251 }
0x1704   :  { %v1072_v16 = vld [vmem:[#allocation12 + $0x8] sm:$0xff] }
0x1705   :  { %2319 = vmatmul.mubr.msk.f32.vlgmr.msra.gmra.mrb[8].mxu1 %vm210_vm2, %v1072_v16 }
0x1706   :  { %2477 = vmatpush3.bf16.msra.mxu1 %v3119_v9  ;;  %2340 = vmatprep.mubr.msk.f32.mxu1 %vm2824_vm0, %v2825_v1 }
0x1707   :  { %2478 = vmatprep.subr.bf16.mxu1 %v2823_v0 }
0x170a   :  { %2480 = vmatpush3.bf16.msra.mxu1 %v3122_v13 }
0x170b   :  { %2487 = vmatprep.subr.bf16.mxu1 %v2823_v0 }
0x17d8   :  { %v2320_v20 = vpop.f32.mrb[8].mxu1 }
0x17d9   :  { %v1157_v21 = vadd.f32 %v2320_v20, %v2096_v19  ;;  %v1151_v22 = vpop.f32.mrb[9].mxu1 }
0x17da   :  { %v1152_v23 = vadd.f32 %v2096_v19, %v1151_v22 }
0x17db   :  { %1161 = vst [vmem:[#allocation2 + $0x8] sm:$0xff] %v1157_v21 }
0x17dc   :  { %1160 = vst [vmem:[#allocation2] sm:$0xff] %v1152_v23 }
0x17e3   :  { %v1166_v24 = vld [vmem:[#allocation2] sm:$0x3]  ;;  %v1276_v44 = vld [vmem:[#allocation2 + $0x2] sm:$0x3]  ;;  %v1381_v3 = vld [vmem:[#allocation2 + $0x4] sm:$0x3] }
0x17e4   :  { %v1240_v25 = vadd.f32 %v1236_v17, %v1166_v24 }
0x17e6   :  { %v2102_v26 = vmul.f32 -1.442695, %v1240_v25  ;;  %v1486_v25 = vld [vmem:[#allocation2 + $0x6] sm:$0x3] }
0x17e8   :  { %2582 = vpow2.f32 %v2102_v26 }
0x17f2   :  { %v2583_v28 = vpop.eup %2582 }
0x17f3   :  { %v1244_v29 = vadd.f32 1.0, %v2583_v28 }
0x17f5   :  { %2584 = vrcp.f32 %v1244_v29 }
0x17ff   :  { %v2585_v30 = vpop.eup %2584 }
0x1800   :  { %v1247_v31 = vmul.f32 2.0, %v2585_v30 }
0x1802   :  { %v2103_v32 = vadd.f32 -1.0, %v1247_v31 }
0x1804   :  { %v1249_v33 = vsel %vm107_vm3, %v2103_v32, %v2585_v30 }
0x1805   :  { %1256 = vrot.lane.b32.xlu1 %v1249_v33, %s2826_s3  ;;  %v1254_v37 = vmul.f32 %v1252_v36, %v1249_v33 }
0x1877   :  { %v1257_v34 = vpop.permute.xlu1 %1256 }
0x1878   :  { %v1259_v35 = vmul.f32 %v1257_v34, %v1249_v33 }
0x187a   :  { %1261 = vrot.lane.b32.xlu1 %v1259_v35, %s2826_s3 }
0x18ec   :  { %v1262_v38 = vpop.permute.xlu1 %1261 }
0x18ed   :  { %v1264_v39 = vadd.f32 %v1262_v38, %v1254_v37 }
0x18ef   :  { %2586 = vtanh.f32 %v1264_v39 }
0x18f9   :  { %v2587_v40 = vpop.eup %2586 }
0x18fa   :  { %1267 = vrot.lane.b32.xlu0 %v2587_v40, %s2826_s3 }
0x196c   :  { %v1268_v41 = vpop.permute.xlu0 %1267 }
0x196d   :  { %v1270_v42 = vmul.f32 %v1268_v41, %v1249_v33 }
0x196f   :  { %1272 = vrot.lane.b32.xlu1 %v1270_v42, %s2827_s26 }
0x19e1   :  { %v1273_v43 = vpop.permute.xlu1 %1272 }
0x19e2   :  { %1275 = vst.msk [vmem:[#allocation12] sm:$0x3] %vm319_vm4, %v1273_v43  ;;  %2341 = vmatmul.mubr.msk.f32.vlgmr.msra.gmra.mrb[10].mxu1 %vm210_vm2, %v1273_v43 }
0x19e3   :  { %2489 = vmatpush3.bf16.msra.mxu1 %v3119_v9  ;;  %2362 = vmatprep.mubr.msk.f32.mxu1 %vm2824_vm0, %v2825_v1 }
0x19e4   :  { %2490 = vmatprep.subr.bf16.mxu1 %v2823_v0 }
0x19e7   :  { %2492 = vmatpush3.bf16.msra.mxu1 %v3122_v13 }
0x19e8   :  { %2499 = vmatprep.subr.bf16.mxu1 %v2823_v0 }
0x1ab5   :  { %v1345_v45 = vpop.f32.mrb[10].mxu1 }
0x1ab6   :  { %v1349_v46 = vadd.f32 %v1345_v45, %v1276_v44  ;;  %v2342_v47 = vpop.f32.mrb[11].mxu1 }
0x1ab8   :  { %v2105_v48 = vmul.f32 -1.442695, %v1349_v46  ;;  %v1591_v46 = vld [vmem:[#allocation2 + $0x8] sm:$0x3] }
0x1aba   :  { %2588 = vpow2.f32 %v2105_v48 }
0x1ac4   :  { %v2589_v49 = vpop.eup %2588 }
0x1ac5   :  { %v1353_v50 = vadd.f32 1.0, %v2589_v49 }
0x1ac7   :  { %2590 = vrcp.f32 %v1353_v50 }
0x1ad1   :  { %v2591_v51 = vpop.eup %2590 }
0x1ad2   :  { %v1356_v52 = vmul.f32 2.0, %v2591_v51 }
0x1ad4   :  { %v2106_v53 = vadd.f32 -1.0, %v1356_v52 }
0x1ad6   :  { %v1358_v54 = vsel %vm107_vm3, %v2106_v53, %v2591_v51 }
0x1ad7   :  { %1361 = vrot.lane.b32.xlu0 %v1358_v54, %s2826_s3  ;;  %v1359_v57 = vmul.f32 %v1358_v54, %v1264_v39 }
0x1b49   :  { %v1362_v55 = vpop.permute.xlu0 %1361 }
0x1b4a   :  { %v1364_v56 = vmul.f32 %v1362_v55, %v1358_v54 }
0x1b4c   :  { %1366 = vrot.lane.b32.xlu1 %v1364_v56, %s2826_s3 }
0x1bbe   :  { %v1367_v58 = vpop.permute.xlu1 %1366 }
0x1bbf   :  { %v1369_v60 = vadd.f32 %v1367_v58, %v1359_v57 }
0x1bc1   :  { %2592 = vtanh.f32 %v1369_v60 }
0x1bcb   :  { %v2593_v61 = vpop.eup %2592 }
0x1bcc   :  { %1372 = vrot.lane.b32.xlu0 %v2593_v61, %s2826_s3 }
0x1c3e   :  { %v1373_v62 = vpop.permute.xlu0 %1372 }
0x1c3f   :  { %v1375_v63 = vmul.f32 %v1373_v62, %v1358_v54 }
0x1c41   :  { %1377 = vrot.lane.b32.xlu1 %v1375_v63, %s2827_s26 }
0x1cb3   :  { %v1378_v2 = vpop.permute.xlu1 %1377 }
0x1cb4   :  { %1380 = vst.msk [vmem:[#allocation12 + $0x2] sm:$0x3] %vm319_vm4, %v1378_v2  ;;  %2352 = vmatmul.mubr.msk.f32.vlgmr.msra.gmra.mrb[12].mxu0 %vm210_vm2, %v1378_v2 }
0x1cb5   :  { %2495 = vmatpush3.bf16.msra.mxu0 %v3119_v9  ;;  %2373 = vmatprep.mubr.msk.f32.mxu0 %vm2824_vm0, %v2825_v1 }
0x1cb6   :  { %2496 = vmatprep.subr.bf16.mxu0 %v2823_v0 }
0x1cb9   :  { %2498 = vmatpush3.bf16.msra.mxu0 %v3122_v13 }
0x1cba   :  { %2505 = vmatprep.subr.bf16.mxu0 %v2823_v0 }
0x1d87   :  { %v1450_v4 = vpop.f32.mrb[12].mxu0 }
0x1d88   :  { %v1454_v5 = vadd.f32 %v1450_v4, %v1381_v3  ;;  %v2353_v6 = vpop.f32.mrb[13].mxu0 }
0x1d8a   :  { %v2108_v7 = vmul.f32 -1.442695, %v1454_v5  ;;  %v1696_v5 = vld [vmem:[#allocation2 + $0xa] sm:$0x3] }
0x1d8c   :  { %2594 = vpow2.f32 %v2108_v7 }
0x1d96   :  { %v2595_v10 = vpop.eup %2594 }
0x1d97   :  { %v1458_v8 = vadd.f32 1.0, %v2595_v10 }
0x1d99   :  { %2596 = vrcp.f32 %v1458_v8 }
0x1da3   :  { %v2597_v11 = vpop.eup %2596 }
0x1da4   :  { %v1461_v12 = vmul.f32 2.0, %v2597_v11 }
0x1da6   :  { %v2109_v14 = vadd.f32 -1.0, %v1461_v12 }
0x1da8   :  { %v1463_v15 = vsel %vm107_vm3, %v2109_v14, %v2597_v11 }
0x1da9   :  { %1466 = vrot.lane.b32.xlu0 %v1463_v15, %s2826_s3  ;;  %v1464_v18 = vmul.f32 %v1463_v15, %v1369_v60 }
0x1e1b   :  { %v1467_v16 = vpop.permute.xlu0 %1466 }
0x1e1c   :  { %v1469_v17 = vmul.f32 %v1467_v16, %v1463_v15 }
0x1e1e   :  { %1471 = vrot.lane.b32.xlu1 %v1469_v17, %s2826_s3 }
0x1e90   :  { %v1472_v19 = vpop.permute.xlu1 %1471 }
0x1e91   :  { %v1474_v20 = vadd.f32 %v1472_v19, %v1464_v18 }
0x1e93   :  { %2598 = vtanh.f32 %v1474_v20 }
0x1e9d   :  { %v2599_v21 = vpop.eup %2598 }
0x1e9e   :  { %1477 = vrot.lane.b32.xlu0 %v2599_v21, %s2826_s3 }
0x1f10   :  { %v1478_v22 = vpop.permute.xlu0 %1477 }
0x1f11   :  { %v1480_v23 = vmul.f32 %v1478_v22, %v1463_v15 }
0x1f13   :  { %1482 = vrot.lane.b32.xlu1 %v1480_v23, %s2827_s26  ;;  %v1801_v23 = vld [vmem:[#allocation2 + $0xc] sm:$0x3] }
0x1f85   :  { %v1483_v24 = vpop.permute.xlu1 %1482 }
0x1f86   :  { %1485 = vst.msk [vmem:[#allocation12 + $0x4] sm:$0x3] %vm319_vm4, %v1483_v24  ;;  %2363 = vmatmul.mubr.msk.f32.vlgmr.msra.gmra.mrb[12].mxu1 %vm210_vm2, %v1483_v24 }
0x1f87   :  { %2501 = vmatpush3.bf16.msra.mxu1 %v3119_v9  ;;  %2384 = vmatprep.mubr.msk.f32.mxu1 %vm2824_vm0, %v2825_v1 }
0x1f88   :  { %2502 = vmatprep.subr.bf16.mxu1 %v2823_v0 }
0x1f8b   :  { %2504 = vmatpush3.bf16.msra.mxu1 %v3122_v13 }
0x1f8c   :  { %2511 = vmatprep.subr.bf16.mxu1 %v2823_v0 }
0x2059   :  { %v1555_v26 = vpop.f32.mrb[12].mxu1 }
0x205a   :  { %v1559_v28 = vadd.f32 %v1555_v26, %v1486_v25  ;;  %v2364_v29 = vpop.f32.mrb[13].mxu1 }
0x205c   :  { %v2111_v30 = vmul.f32 -1.442695, %v1559_v28 }
0x205e   :  { %2600 = vpow2.f32 %v2111_v30 }
0x2068   :  { %v2601_v31 = vpop.eup %2600 }
0x2069   :  { %v1563_v32 = vadd.f32 1.0, %v2601_v31 }
0x206b   :  { %2602 = vrcp.f32 %v1563_v32 }
0x2075   :  { %v2603_v33 = vpop.eup %2602 }
0x2076   :  { %v1566_v34 = vmul.f32 2.0, %v2603_v33 }
0x2078   :  { %v2112_v35 = vadd.f32 -1.0, %v1566_v34 }
0x207a   :  { %v1568_v36 = vsel %vm107_vm3, %v2112_v35, %v2603_v33 }
0x207b   :  { %1571 = vrot.lane.b32.xlu0 %v1568_v36, %s2826_s3  ;;  %v1569_v39 = vmul.f32 %v1568_v36, %v1474_v20 }
0x20ed   :  { %v1572_v37 = vpop.permute.xlu0 %1571 }
0x20ee   :  { %v1574_v38 = vmul.f32 %v1572_v37, %v1568_v36 }
0x20f0   :  { %1576 = vrot.lane.b32.xlu1 %v1574_v38, %s2826_s3 }
0x2162   :  { %v1577_v40 = vpop.permute.xlu1 %1576 }
0x2163   :  { %v1579_v41 = vadd.f32 %v1577_v40, %v1569_v39 }
0x2165   :  { %2604 = vtanh.f32 %v1579_v41 }
0x216f   :  { %v2605_v42 = vpop.eup %2604 }
0x2170   :  { %1582 = vrot.lane.b32.xlu0 %v2605_v42, %s2826_s3 }
0x21e2   :  { %v1583_v43 = vpop.permute.xlu0 %1582 }
0x21e3   :  { %v1585_v44 = vmul.f32 %v1583_v43, %v1568_v36 }
0x21e5   :  { %1587 = vrot.lane.b32.xlu1 %v1585_v44, %s2827_s26  ;;  %v1906_v44 = vld [vmem:[#allocation2 + $0xe] sm:$0x3] }
0x2257   :  { %v1588_v45 = vpop.permute.xlu1 %1587 }
0x2258   :  { %1590 = vst.msk [vmem:[#allocation12 + $0x6] sm:$0x3] %vm319_vm4, %v1588_v45  ;;  %2374 = vmatmul.mubr.msk.f32.vlgmr.msra.gmra.mrb[14].mxu0 %vm210_vm2, %v1588_v45 }
0x2259   :  { %2507 = vmatpush3.bf16.msra.mxu0 %v3119_v9  ;;  %2395 = vmatprep.mubr.msk.f32.mxu0 %vm2824_vm0, %v2825_v1 }
0x225a   :  { %2508 = vmatprep.subr.bf16.mxu0 %v2823_v0 }
0x225d   :  { %2510 = vmatpush3.bf16.msra.mxu0 %v3122_v13 }
0x232b   :  { %v1660_v47 = vpop.f32.mrb[14].mxu0 }
0x232c   :  { %v1664_v48 = vadd.f32 %v1660_v47, %v1591_v46  ;;  %v2375_v49 = vpop.f32.mrb[15].mxu0 }
0x232e   :  { %v2114_v50 = vmul.f32 -1.442695, %v1664_v48 }
0x2330   :  { %2606 = vpow2.f32 %v2114_v50 }
0x233a   :  { %v2607_v51 = vpop.eup %2606 }
0x233b   :  { %v1668_v52 = vadd.f32 1.0, %v2607_v51 }
0x233d   :  { %2608 = vrcp.f32 %v1668_v52 }
0x2347   :  { %v2609_v53 = vpop.eup %2608 }
0x2348   :  { %v1671_v54 = vmul.f32 2.0, %v2609_v53 }
0x234a   :  { %v2115_v55 = vadd.f32 -1.0, %v1671_v54 }
0x234c   :  { %v1673_v56 = vsel %vm107_vm3, %v2115_v55, %v2609_v53 }
0x234d   :  { %1676 = vrot.lane.b32.xlu0 %v1673_v56, %s2826_s3  ;;  %v1674_v60 = vmul.f32 %v1673_v56, %v1579_v41 }
0x23bf   :  { %v1677_v57 = vpop.permute.xlu0 %1676 }
0x23c0   :  { %v1679_v58 = vmul.f32 %v1677_v57, %v1673_v56 }
0x23c2   :  { %1681 = vrot.lane.b32.xlu1 %v1679_v58, %s2826_s3 }
0x2434   :  { %v1682_v61 = vpop.permute.xlu1 %1681 }
0x2435   :  { %v1684_v62 = vadd.f32 %v1682_v61, %v1674_v60 }
0x2437   :  { %2610 = vtanh.f32 %v1684_v62 }
0x2441   :  { %v2611_v63 = vpop.eup %2610 }
0x2442   :  { %1687 = vrot.lane.b32.xlu0 %v2611_v63, %s2826_s3 }
0x24b4   :  { %v1688_v2 = vpop.permute.xlu0 %1687 }
0x24b5   :  { %v1690_v3 = vmul.f32 %v1688_v2, %v1673_v56 }
0x24b7   :  { %1692 = vrot.lane.b32.xlu1 %v1690_v3, %s2827_s26 }
0x2529   :  { %v1693_v4 = vpop.permute.xlu1 %1692 }
0x252a   :  { %1695 = vst.msk [vmem:[#allocation12 + $0x8] sm:$0x3] %vm319_vm4, %v1693_v4  ;;  %2385 = vmatmul.mubr.msk.f32.vlgmr.msra.gmra.mrb[14].mxu1 %vm210_vm2, %v1693_v4 }
0x252b   :  { %2513 = vmatpush3.bf16.msra.mxu1 %v3119_v9  ;;  %2406 = vmatprep.mubr.msk.f32.mxu1 %vm2824_vm0, %v2825_v1 }
0x252c   :  { %2514 = vmatprep.subr.bf16.mxu1 %v2823_v0 }
0x252f   :  { %2516 = vmatpush3.bf16.msra.mxu1 %v3122_v13 }
0x25fd   :  { %v1765_v6 = vpop.f32.mrb[14].mxu1 }
0x25fe   :  { %v1769_v7 = vadd.f32 %v1765_v6, %v1696_v5  ;;  %v2386_v10 = vpop.f32.mrb[15].mxu1 }
0x2600   :  { %v2117_v8 = vmul.f32 -1.442695, %v1769_v7 }
0x2602   :  { %2612 = vpow2.f32 %v2117_v8 }
0x260c   :  { %v2613_v11 = vpop.eup %2612 }
0x260d   :  { %v1773_v12 = vadd.f32 1.0, %v2613_v11 }
0x260f   :  { %2614 = vrcp.f32 %v1773_v12 }
0x2619   :  { %v2615_v14 = vpop.eup %2614 }
0x261a   :  { %v1776_v15 = vmul.f32 2.0, %v2615_v14 }
0x261c   :  { %v2118_v16 = vadd.f32 -1.0, %v1776_v15 }
0x261e   :  { %v1778_v9 = vsel %vm107_vm3, %v2118_v16, %v2615_v14 }
0x261f   :  { %1781 = vrot.lane.b32.xlu0 %v1778_v9, %s2826_s3  ;;  %v1779_v13 = vmul.f32 %v1778_v9, %v1684_v62 }
0x2691   :  { %v1782_v0 = vpop.permute.xlu0 %1781 }
0x2692   :  { %v1784_v1 = vmul.f32 %v1782_v0, %v1778_v9 }
0x2694   :  { %1786 = vrot.lane.b32.xlu1 %v1784_v1, %s2826_s3 }
0x2706   :  { %v1787_v17 = vpop.permute.xlu1 %1786 }
0x2707   :  { %v1789_v18 = vadd.f32 %v1787_v17, %v1779_v13 }
0x2709   :  { %2616 = vtanh.f32 %v1789_v18 }
0x2713   :  { %v2617_v19 = vpop.eup %2616 }
0x2714   :  { %1792 = vrot.lane.b32.xlu0 %v2617_v19, %s2826_s3 }
0x2786   :  { %v1793_v20 = vpop.permute.xlu0 %1792 }
0x2787   :  { %v1795_v21 = vmul.f32 %v1793_v20, %v1778_v9 }
0x2789   :  { %1797 = vrot.lane.b32.xlu1 %v1795_v21, %s2827_s26 }
0x27fb   :  { %v1798_v22 = vpop.permute.xlu1 %1797 }
0x27fc   :  { %1800 = vst.msk [vmem:[#allocation12 + $0xa] sm:$0x3] %vm319_vm4, %v1798_v22  ;;  %2396 = vmatmul.mubr.msk.f32.vlgmr.msra.gmra.mrb[16].mxu0 %vm210_vm2, %v1798_v22 }
0x28cf   :  { %v1870_v24 = vpop.f32.mrb[16].mxu0 }
0x28d0   :  { %v1874_v25 = vadd.f32 %v1870_v24, %v1801_v23  ;;  %v2397_v26 = vpop.f32.mrb[17].mxu0 }
0x28d2   :  { %v2120_v28 = vmul.f32 -1.442695, %v1874_v25 }
0x28d4   :  { %2618 = vpow2.f32 %v2120_v28 }
0x28de   :  { %v2619_v29 = vpop.eup %2618 }
0x28df   :  { %v1878_v30 = vadd.f32 1.0, %v2619_v29 }
0x28e1   :  { %2620 = vrcp.f32 %v1878_v30 }
0x28eb   :  { %v2621_v31 = vpop.eup %2620 }
0x28ec   :  { %v1881_v32 = vmul.f32 2.0, %v2621_v31 }
0x28ee   :  { %v2121_v33 = vadd.f32 -1.0, %v1881_v32 }
0x28f0   :  { %v1883_v34 = vsel %vm107_vm3, %v2121_v33, %v2621_v31 }
0x28f1   :  { %1886 = vrot.lane.b32.xlu0 %v1883_v34, %s2826_s3  ;;  %v1884_v37 = vmul.f32 %v1883_v34, %v1789_v18 }
0x2963   :  { %v1887_v35 = vpop.permute.xlu0 %1886 }
0x2964   :  { %v1889_v36 = vmul.f32 %v1887_v35, %v1883_v34 }
0x2966   :  { %1891 = vrot.lane.b32.xlu1 %v1889_v36, %s2826_s3 }
0x29d8   :  { %v1892_v38 = vpop.permute.xlu1 %1891 }
0x29d9   :  { %v1894_v39 = vadd.f32 %v1892_v38, %v1884_v37 }
0x29db   :  { %2622 = vtanh.f32 %v1894_v39 }
0x29e5   :  { %v2623_v40 = vpop.eup %2622 }
0x29e6   :  { %1897 = vrot.lane.b32.xlu0 %v2623_v40, %s2826_s3 }
0x2a58   :  { %v1898_v41 = vpop.permute.xlu0 %1897 }
0x2a59   :  { %v1900_v42 = vmul.f32 %v1898_v41, %v1883_v34 }
0x2a5b   :  { %1902 = vrot.lane.b32.xlu1 %v1900_v42, %s2827_s26 }
0x2acd   :  { %v1903_v43 = vpop.permute.xlu1 %1902 }
0x2ace   :  { %1905 = vst.msk [vmem:[#allocation12 + $0xc] sm:$0x3] %vm319_vm4, %v1903_v43  ;;  %2407 = vmatmul.mubr.msk.f32.vlgmr.msra.gmra.mrb[16].mxu1 %vm210_vm2, %v1903_v43 }
0x2ba1   :  { %v1975_v45 = vpop.f32.mrb[16].mxu1 }
0x2ba2   :  { %v1979_v46 = vadd.f32 %v1975_v45, %v1906_v44  ;;  %v2408_v47 = vpop.f32.mrb[17].mxu1 }
0x2ba4   :  { %v2123_v48 = vmul.f32 -1.442695, %v1979_v46 }
0x2ba6   :  { %2624 = vpow2.f32 %v2123_v48 }
0x2bb0   :  { %v2625_v49 = vpop.eup %2624 }
0x2bb1   :  { %v1983_v50 = vadd.f32 1.0, %v2625_v49 }
0x2bb3   :  { %2626 = vrcp.f32 %v1983_v50 }
0x2bbd   :  { %v2627_v51 = vpop.eup %2626 }
0x2bbe   :  { %v1986_v52 = vmul.f32 2.0, %v2627_v51 }
0x2bc0   :  { %v2124_v53 = vadd.f32 -1.0, %v1986_v52 }
0x2bc2   :  { %v1988_v54 = vsel %vm107_vm3, %v2124_v53, %v2627_v51 }
0x2bc3   :  { %1991 = vrot.lane.b32.xlu0 %v1988_v54, %s2826_s3  ;;  %v1989_v57 = vmul.f32 %v1988_v54, %v1894_v39 }
0x2c35   :  { %v1992_v55 = vpop.permute.xlu0 %1991 }
0x2c36   :  { %v1994_v56 = vmul.f32 %v1992_v55, %v1988_v54 }
0x2c38   :  { %1996 = vrot.lane.b32.xlu1 %v1994_v56, %s2826_s3 }
0x2caa   :  { %v1997_v58 = vpop.permute.xlu1 %1996 }
0x2cab   :  { %v1999_v60 = vadd.f32 %v1997_v58, %v1989_v57 }
0x2cad   :  { %2628 = vtanh.f32 %v1999_v60 }
0x2cb7   :  { %v2629_v61 = vpop.eup %2628 }
0x2cb8   :  { %2002 = vrot.lane.b32.xlu0 %v2629_v61, %s2826_s3 }
0x2cbc   :  { %1058 = vrot.lane.b32.xlu0 %v3114_v59, %s2828_s6 }
0x2d2a   :  { %v2003_v62 = vpop.permute.xlu0 %2002 }
0x2d2b   :  { %v2005_v63 = vmul.f32 %v2003_v62, %v1988_v54 }
0x2d2d   :  { %2007 = vrot.lane.b32.xlu1 %v2005_v63, %s2827_s26 }
0x2d2e   :  { %v1059_v27 = vpop.permute.xlu0 %1058 }
0x2d2f   :  { %1061 = vst.msk [vmem:[#allocation15] sm:$0x3] %vm319_vm4, %v1059_v27 }
0x2d31   :  { %2014 = vrot.lane.b32.xlu1 %v1999_v60, %s2828_s6 }
0x2d9f   :  { %v2008_v2 = vpop.permute.xlu1 %2007 }
0x2da0   :  { %2010 = vst.msk [vmem:[#allocation12 + $0xe] sm:$0x3] %vm319_vm4, %v2008_v2  ;;  %2012 = vst.msk [vmem:[#allocation13 + $0x2] sm:$0x3] %vm319_vm4, %v2008_v2 }
0x2da1   :  { %2751 = shalt.err (!%p2748_p2)
}
0x2da2   :  { %s2752_s2 = scalar_lea.hbm %s3318_s10, 64 }
0x2da3   :  { %p2753_p3 = scmp.ne.s32.totalorder %s3318_s10, %s2752_s2  ;;  %p2756_p4 = scmp.lt.u32.totalorder %s2752_s2, %s3318_s10 }
0x2da5   :  { %p2758_p5 = pnand %p2756_p4, %p2753_p3 }
0x2da7   :  { %2761 = shalt.err (!%p2758_p5)
}
0x2da8   :  { %s2832_s1 = smov 2   ;;  %s2762_s26 = scalar_lea.vmem %s3246_s16, 256 }
0x2da9   :  { %2042 = dma.vmem_to_hbm [thread:$0]  %s2037_s14, 64, %s3318_s10, [#allocation14], %s2826_s3, %s2826_s3, %s2832_s1  }
0x2daa   :  { %p2763_p6 = scmp.ne.s32.totalorder %s3246_s16, %s2762_s26  ;;  %p2767_p7 = scmp.lt.s32.totalorder %s3246_s16, %s3246_s16 }
0x2dab   :  { %p2768_p8 = scmp.lt.s32.totalorder %s2762_s26, %s2762_s26 }
0x2dad   :  { %p2769_p9 = por %p2768_p8, %p2767_p7 }
0x2daf   :  { %p2770_p10 = pnand %p2769_p9, %p2763_p6 }
0x2db1   :  { %2773 = shalt.err (!%p2770_p10)
}
0x2db2   :  { %s2774_s25 = scalar_lea.hbm %s3317_s9, 256 }
0x2db3   :  { %p2775_p11 = scmp.ne.s32.totalorder %s3317_s9, %s2774_s25  ;;  %p2778_p12 = scmp.lt.u32.totalorder %s2774_s25, %s3317_s9 }
0x2db5   :  { %p2780_p13 = pnand %p2778_p12, %p2775_p11 }
0x2db7   :  { %2783 = shalt.err (!%p2780_p13)
}
0x2db8   :  { %2030 = dma.vmem_to_hbm [thread:$0]  %s3246_s16, 256, %s3317_s9, [#allocation5], %s2818_s29, %s2818_s29, %s2819_s30   ;;  %v2015_v59 = vpop.permute.xlu1 %2014 }
0x2db9   :  { %2018 = vst.msk [vmem:[#allocation15 + $0x2] sm:$0x3] %vm319_vm4, %v2015_v59  ;;  %s2784_s14 = scalar_lea.vmem %s3250_s4, 64  ;;  %p2789_p1 = scmp.lt.s32.totalorder %s3250_s4, %s3250_s4 }
0x2dba   :  { %p2785_p0 = scmp.ne.s32.totalorder %s3250_s4, %s2784_s14  ;;  %p2790_p2 = scmp.lt.s32.totalorder %s2784_s14, %s2784_s14 }
0x2dbc   :  { %p2791_p3 = por %p2790_p2, %p2789_p1 }
0x2dbe   :  { %p2792_p4 = pnand %p2791_p3, %p2785_p0 }
0x2dc0   :  { %2795 = shalt.err (!%p2792_p4)
}
0x2dc1   :  { %s2796_s20 = scalar_lea.hbm %s3319_s11, 64 }
0x2dc2   :  { %p2797_p5 = scmp.ne.s32.totalorder %s3319_s11, %s2796_s20  ;;  %p2800_p6 = scmp.lt.u32.totalorder %s2796_s20, %s3319_s11 }
0x2dc4   :  { %p2802_p7 = pnand %p2800_p6, %p2797_p5 }
0x2dc6   :  { %2805 = shalt.err (!%p2802_p7)
}
0x2dc7   :  { %2054 = dma.vmem_to_hbm [thread:$0]  %s3250_s4, 64, %s3319_s11, [#allocation14], %s2826_s3, %s2826_s3, %s2832_s1  }
0x2dc8   :  { %2812 = dma.done.wait [#allocation5], 256  }
0x2dc9   :  { %2813 = vsyncadd [#allocation5], 4294967040 }
0x2dca   :  { %2814 = dma.done.wait [#allocation14], 128  }
0x2dcb   :  { %2815 = vsyncadd [#allocation14], 4294967168 }
0x2dcc   :  { %2064 = vsyncpa [#allocation4], 1 }
0x2dcd   :  { %2065 = vsyncpa [#allocation7], 1 }
0x2dce   :  { %2066 = vsyncpa [#allocation10], 1 }
0x2dcf   :  { %2067 = vsyncpa [#allocation5], 1 }
0x2dd0   :  { %2068 = vsyncpa [#allocation14], 1 }

</bundles_post_ra>
